<compile_context>
chip_gen: v7x
topology: tpu7x:2x2x1
jax: 0.10.0
libtpu: 0.0.40
codegen_flags: <defaults>
</compile_context>

<pallas_src>
import jax
import jax.numpy as jnp
from jax.experimental import pallas as pl
from jax.experimental.pallas import tpu as pltpu


def _round_up(x, m):
    return ((x + m - 1) // m) * m


def _make_fused_kernel(ROWS, Wp, mask_ch, inv_hw):
    """conv3x3 (single K-packed matmul) + bias + ReLU + masked GAP accumulation,
    head matmul on the last row tile of each image."""

    def kernel(xb_ref, xh_ref, w_ref, cb_ref, hw_ref, hb_ref, o_ref, pool_acc):
        # xb_ref : [1, ROWS, C3]   bf16  body row-tile (dw-packed channels + mask ch)
        # xh_ref : [1, 2*Wp, C3]   bf16  2-row halo following the body tile
        # w_ref  : [3*C3, CPAD]    bf16  K-packed conv weights (Cout zero-padded to 128)
        # cb_ref : [1, CPAD] f32, hw_ref: [CPAD, NCPAD] f32, hb_ref: [1, NCPAD] f32
        # o_ref  : [1, 1, NCPAD]   f32   logits for this image (written on last tile)
        # pool_acc: VMEM [1, CPAD] f32   running sum for the global average pool
        t = pl.program_id(1)

        @pl.when(t == 0)
        def _init():
            pool_acc[...] = jnp.zeros_like(pool_acc)

        body = xb_ref[0]                                       # [ROWS, C3]
        slab = jnp.concatenate([body, xh_ref[0]], axis=0)      # [ROWS + 2*Wp, C3]

        # K-packed patch: three vertically shifted, 16-aligned slices concatenated
        # along lanes -> [ROWS, 3*C3]; dw shifts already live in the channel dim.
        patch = jnp.concatenate(
            [slab[dh * Wp:dh * Wp + ROWS, :] for dh in range(3)], axis=1)

        # single MXU matmul (K = 3*C3) instead of 9 matmuls with K = Cin
        acc = jnp.dot(patch, w_ref[...], preferred_element_type=jnp.float32)
        y = jnp.maximum(acc + cb_ref[...], 0.0)                # bias + ReLU

        # validity of each output position (kills padding cols / tail rows);
        # jnp.where (not multiply) so non-finite garbage cannot leak into the pool.
        valid = body[:, mask_ch:mask_ch + 1] > 0.0             # [ROWS, 1]
        y = jnp.where(valid, y, 0.0)
        pool_acc[...] += jnp.sum(y, axis=0, keepdims=True)     # [1, CPAD]

        @pl.when(t == pl.num_programs(1) - 1)
        def _finalize():
            pooled = pool_acc[...] * inv_hw                    # [1, CPAD]
            logits = jnp.dot(pooled, hw_ref[...],
                             preferred_element_type=jnp.float32) + hb_ref[...]
            o_ref[...] = logits[None]                          # [1, 1, NCPAD]

    return kernel


@jax.jit
def network_forward(params, x_nchw):
    # NCHW (PyTorch) -> NHWC, bf16 for MXU / HBM traffic.
    x = jnp.transpose(x_nchw, (0, 2, 3, 1)).astype(jnp.bfloat16)
    N, H, W, Cin = x.shape
    Cmid = params["conv_w"].shape[-1]
    n_cls = params["head_w"].shape[-1]
    CPAD = _round_up(max(Cmid, 128), 128)      # lane-dense conv output channels
    NCPAD = _round_up(max(n_cls, 128), 128)    # lane-dense head output

    # geometry: Wp multiple of 16 so bf16 (16,128) tiles never get split by the
    # in-kernel dh*Wp slices or the block boundaries.
    Wp = _round_up(W + 2, 16)
    # tile by flattened rows (~1k positions/step); TH even; n_t == 1 for small imgs
    TARGET_ROWS = 1024
    TH = min(_round_up(H, 2), max(2, 2 * (TARGET_ROWS // (2 * Wp))))
    n_t = pl.cdiv(H, TH)
    Hp = n_t * TH + 2                          # 1 top pad row + >=1 bottom pad rows
    ROWS = TH * Wp                             # output positions per grid step
    HALO = 2 * Wp                              # extra rows needed by the 3x3 window

    C3 = _round_up(3 * Cin + 1, 8)             # dw-packed channels + mask + zero pad
    mask_ch = 3 * Cin
    K9 = 3 * C3

    # zero pad: 1 top row, 1 left col, extra right cols (covers Wp and the dw shifts)
    xp = jnp.pad(x, ((0, 0), (1, Hp - H - 1), (1, Wp + 1 - W), (0, 0)))  # [N,Hp,Wp+2,Cin]

    # dw-pack the three horizontal taps into channels (layout plumbing in the
    # wrapper keeps every in-kernel slice aligned), append the validity channel.
    xsh = jnp.concatenate([xp[:, :, dw:dw + Wp, :] for dw in range(3)], axis=-1)
    valid = (jnp.arange(Hp) < H)[:, None] & (jnp.arange(Wp) < W)[None, :]
    maskch = jnp.broadcast_to(valid[None, :, :, None],
                              (N, Hp, Wp, 1)).astype(jnp.bfloat16)
    extra = jnp.zeros((N, Hp, Wp, C3 - 3 * Cin - 1), jnp.bfloat16)
    xpack = jnp.concatenate([xsh, maskch, extra], axis=-1)     # [N, Hp, Wp, C3]
    xflat = xpack.reshape(N, Hp * Wp, C3)                      # row-flattened

    # K-packed conv weights: row dh*C3 + dw*Cin + ci  <-  conv_w[dh, dw, ci, :]
    wr = params["conv_w"].astype(jnp.bfloat16).reshape(3, 3 * Cin, Cmid)
    w9 = (jnp.zeros((3, C3, CPAD), jnp.bfloat16)
          .at[:, :3 * Cin, :Cmid].set(wr)
          .reshape(K9, CPAD))
    cb = jnp.zeros((1, CPAD), jnp.float32).at[0, :Cmid].set(params["conv_b"])
    hw = jnp.zeros((CPAD, NCPAD), jnp.float32).at[:Cmid, :n_cls].set(params["head_w"])
    hb = jnp.zeros((1, NCPAD), jnp.float32).at[0, :n_cls].set(params["head_b"])

    # generation-aware VMEM limit (v5e/v6e: 128 MiB physical; v7x: 64 MiB per TC)
    try:
        vmem_cap = pltpu.get_tpu_info().vmem_capacity_bytes
    except Exception:
        vmem_cap = 64 * 1024 * 1024
    vmem_limit = int(max(32 * 1024 * 1024,
                         min(100 * 1024 * 1024, (vmem_cap * 3) // 4)))

    kernel = _make_fused_kernel(ROWS, Wp, mask_ch, 1.0 / float(H * W))

    flops = 2 * N * n_t * ROWS * K9 * CPAD + 2 * N * CPAD * NCPAD
    bytes_accessed = (N * n_t * (ROWS + HALO) * C3 * 2
                      + K9 * CPAD * 2 + CPAD * 4 + CPAD * NCPAD * 4 + NCPAD * 4
                      + N * NCPAD * 4)

    out = pl.pallas_call(
        kernel,
        out_shape=jax.ShapeDtypeStruct((N, 1, NCPAD), jnp.float32),
        grid_spec=pltpu.PrefetchScalarGridSpec(
            num_scalar_prefetch=0,
            grid=(N, n_t),                                      # (image, row tile)
            in_specs=[
                # body row tile (no whole-image residency)
                pl.BlockSpec((1, ROWS, C3), lambda n, t: (n, t, 0)),
                # 2-row halo immediately after the body tile (TH is even)
                pl.BlockSpec((1, HALO, C3),
                             lambda n, t: (n, (t + 1) * (TH // 2), 0)),
                # constant parameter blocks (tiny; fetched once per image)
                pl.BlockSpec((K9, CPAD), lambda n, t: (0, 0)),
                pl.BlockSpec((1, CPAD), lambda n, t: (0, 0)),
                pl.BlockSpec((CPAD, NCPAD), lambda n, t: (0, 0)),
                pl.BlockSpec((1, NCPAD), lambda n, t: (0, 0)),
            ],
            out_specs=pl.BlockSpec((1, 1, NCPAD), lambda n, t: (n, 0, 0)),
            scratch_shapes=[pltpu.VMEM((1, CPAD), jnp.float32)],
        ),
        compiler_params=pltpu.CompilerParams(
            dimension_semantics=("parallel", "arbitrary"),      # megacore over images
            vmem_limit_bytes=vmem_limit,
        ),
        cost_estimate=pl.CostEstimate(
            flops=flops, transcendentals=0, bytes_accessed=bytes_accessed),
    )(xflat, xflat, w9, cb, hw, hb)

    return out[:, 0, :n_cls]                                    # [N, num_classes]


def init_params(key, cin=4, cmid=32, num_classes=10):
    k1, k2, k3, k4 = jax.random.split(key, 4)
    return {
        "conv_w": 0.1 * jax.random.normal(k1, (3, 3, cin, cmid), jnp.float32),
        "conv_b": 0.1 * jax.random.normal(k2, (cmid,), jnp.float32),
        "head_w": 0.1 * jax.random.normal(k3, (cmid, num_classes), jnp.float32),
        "head_b": 0.1 * jax.random.normal(k4, (num_classes,), jnp.float32),
    }


def _reference_forward(params, x_nchw):
    # plain-JAX reference (same bf16 rounding of conv operands as the kernel)
    x = jnp.transpose(x_nchw, (0, 2, 3, 1)).astype(jnp.bfloat16).astype(jnp.float32)
    w = params["conv_w"].astype(jnp.bfloat16).astype(jnp.float32)
    y = jax.lax.conv_general_dilated(
        x, w, window_strides=(1, 1), padding="SAME",
        dimension_numbers=("NHWC", "HWIO", "NHWC"))
    y = jnp.maximum(y + params["conv_b"], 0.0)
    pooled = jnp.mean(y, axis=(1, 2))
    return pooled @ params["head_w"] + params["head_b"]


if __name__ == "__main__":
    key = jax.random.PRNGKey(0)
    pkey, xkey = jax.random.split(key)

    N, C, H, W = 2, 4, 16, 16
    num_classes = 10
    params = init_params(pkey, cin=C, cmid=32, num_classes=num_classes)
    x = jax.random.normal(xkey, (N, C, H, W), jnp.float32)

    out = jax.block_until_ready(network_forward(params, x))

    assert out.shape == (N, num_classes), out.shape
    assert bool(jnp.all(jnp.isfinite(out)))
    ref = _reference_forward(params, x)
    assert bool(jnp.allclose(out, ref, rtol=2e-2, atol=2e-2)), (out, ref)
    print("KERNEL_OK")
</pallas_src>

<mosaic_0001>
module attributes {stable_mosaic.version = 11 : i64} {
  func.func @kernel(%arg0: i32, %arg1: i32, %arg2: memref<1x512x16xbf16, #tpu.memory_space<vmem>>, %arg3: memref<1x64x16xbf16, #tpu.memory_space<vmem>>, %arg4: memref<48x128xbf16, #tpu.memory_space<vmem>>, %arg5: memref<1x128xf32, #tpu.memory_space<vmem>>, %arg6: memref<128x128xf32, #tpu.memory_space<vmem>>, %arg7: memref<1x128xf32, #tpu.memory_space<vmem>>, %arg8: memref<1x1x128xf32, #tpu.memory_space<vmem>>, %arg9: memref<1x128xf32, #tpu.memory_space<vmem>>) attributes {dimension_semantics = [#tpu.dimension_semantics<parallel>, #tpu.dimension_semantics<arbitrary>], iteration_bounds = array<i64: 2, 1>, scalar_prefetch = 0 : i64, scratch_operands = 1 : i64, tpu.core_type = #tpu.core_type<tc>, window_params = [{transform_indices = @transform_0, window_bounds = array<i64: 1, 512, 16>}, {transform_indices = @transform_1, window_bounds = array<i64: 1, 64, 16>}, {pipeline_mode = #tpu.pipeline_mode<synchronous>, transform_indices = @transform_2, window_bounds = array<i64: 48, 128>}, {pipeline_mode = #tpu.pipeline_mode<synchronous>, transform_indices = @transform_3, window_bounds = array<i64: 1, 128>}, {pipeline_mode = #tpu.pipeline_mode<synchronous>, transform_indices = @transform_4, window_bounds = array<i64: 128, 128>}, {pipeline_mode = #tpu.pipeline_mode<synchronous>, transform_indices = @transform_5, window_bounds = array<i64: 1, 128>}, {transform_indices = @transform_6, window_bounds = array<i64: 1, 1, 128>}]} {
    %c0_i32 = arith.constant 0 : i32
    %0 = arith.cmpi eq, %arg1, %c0_i32 : i32
    %1 = arith.extui %0 : i1 to i32
    %c0_i32_0 = arith.constant 0 : i32
    %2 = arith.cmpi ne, %1, %c0_i32_0 : i32
    scf.if %2 {
      %cst_20 = arith.constant 0.000000e+00 : f32
      %34 = vector.broadcast %cst_20 : f32 to vector<1x128xf32>
      %c0_21 = arith.constant 0 : index
      %c0_22 = arith.constant 0 : index
      %35 = vector.load %arg9[%c0_21, %c0_22] : memref<1x128xf32, #tpu.memory_space<vmem>>, vector<1x128xf32>
      tpu.vector_store %arg9[%c0_21, %c0_22], %34 {strides = array<i32>} : memref<1x128xf32, #tpu.memory_space<vmem>>, vector<1x128xf32>,
    } else {
    }
    %c0 = arith.constant 0 : index
    %c0_1 = arith.constant 0 : index
    %c0_2 = arith.constant 0 : index
    %3 = vector.load %arg2[%c0, %c0_1, %c0_2] : memref<1x512x16xbf16, #tpu.memory_space<vmem>>, vector<1x512x16xbf16>
    %4 = vector.shape_cast %3 : vector<1x512x16xbf16> to vector<512x16xbf16>
    %c0_3 = arith.constant 0 : index
    %c0_4 = arith.constant 0 : index
    %c0_5 = arith.constant 0 : index
    %5 = vector.load %arg3[%c0_3, %c0_4, %c0_5] : memref<1x64x16xbf16, #tpu.memory_space<vmem>>, vector<1x64x16xbf16>
    %6 = vector.shape_cast %5 : vector<1x64x16xbf16> to vector<64x16xbf16>
    %7 = tpu.concatenate %4, %6 in 0 : vector<512x16xbf16>, vector<64x16xbf16> -> vector<576x16xbf16>
    %8 = vector.extract_strided_slice %7 {offsets = [0, 0], sizes = [512, 16], strides = [1, 1]} : vector<576x16xbf16> to vector<512x16xbf16>
    %9 = vector.extract_strided_slice %7 {offsets = [32, 0], sizes = [512, 16], strides = [1, 1]} : vector<576x16xbf16> to vector<512x16xbf16>
    %10 = vector.extract_strided_slice %7 {offsets = [64, 0], sizes = [512, 16], strides = [1, 1]} : vector<576x16xbf16> to vector<512x16xbf16>
    %11 = tpu.concatenate %8, %9, %10 in 1 : vector<512x16xbf16>, vector<512x16xbf16>, vector<512x16xbf16> -> vector<512x48xbf16>
    %c0_6 = arith.constant 0 : index
    %c0_7 = arith.constant 0 : index
    %12 = vector.load %arg4[%c0_6, %c0_7] : memref<48x128xbf16, #tpu.memory_space<vmem>>, vector<48x128xbf16>
    %cst = arith.constant dense<0.000000e+00> : vector<512x128xf32>
    %13 = tpu.matmul %11, %12, %cst {dimension_numbers = #tpu.dot_dimension_numbers<[1], [0], [0], [1], [0, 0, 1, 1], [], []>} : vector<512x48xbf16>, vector<48x128xbf16>, vector<512x128xf32> -> vector<512x128xf32>
    %c0_8 = arith.constant 0 : index
    %c0_9 = arith.constant 0 : index
    %14 = vector.load %arg5[%c0_8, %c0_9] : memref<1x128xf32, #tpu.memory_space<vmem>>, vector<1x128xf32>
    %15 = vector.broadcast %14 : vector<1x128xf32> to vector<512x128xf32>
    %16 = arith.addf %13, %15 : vector<512x128xf32>
    %cst_10 = arith.constant 0.000000e+00 : f32
    %17 = vector.broadcast %cst_10 : f32 to vector<512x128xf32>
    %18 = arith.maximumf %16, %17 : vector<512x128xf32>
    %19 = vector.extract_strided_slice %4 {offsets = [0, 12], sizes = [512, 1], strides = [1, 1]} : vector<512x16xbf16> to vector<512x1xbf16>
    %cst_11 = arith.constant 0.000000e+00 : bf16
    %20 = vector.broadcast %cst_11 : bf16 to vector<512x1xbf16>
    %21 = arith.cmpf ogt, %19, %20 : vector<512x1xbf16>
    %cst_12 = arith.constant 0.000000e+00 : f32
    %22 = vector.shape_cast %21 : vector<512x1xi1> to vector<512x1xi1>
    %23 = vector.broadcast %22 : vector<512x1xi1> to vector<512x128xi1>
    %24 = vector.broadcast %cst_12 : f32 to vector<512x128xf32>
    %25 = arith.select %23, %18, %24 : vector<512x128xi1>, vector<512x128xf32>
    %c0_13 = arith.constant 0 : index
    %c0_14 = arith.constant 0 : index
    %26 = vector.load %arg9[%c0_13, %c0_14] : memref<1x128xf32, #tpu.memory_space<vmem>>, vector<1x128xf32>
    %cst_15 = arith.constant dense<0.000000e+00> : vector<128xf32>
    %27 = vector.multi_reduction <add>, %25, %cst_15 [0] : vector<512x128xf32> to vector<128xf32>
    %28 = vector.shape_cast %27 : vector<128xf32> to vector<1x128xf32>
    %29 = arith.addf %26, %28 : vector<1x128xf32>
    %c0_16 = arith.constant 0 : index
    %c0_17 = arith.constant 0 : index
    %30 = vector.load %arg9[%c0_16, %c0_17] : memref<1x128xf32, #tpu.memory_space<vmem>>, vector<1x128xf32>
    tpu.vector_store %arg9[%c0_16, %c0_17], %29 {strides = array<i32>} : memref<1x128xf32, #tpu.memory_space<vmem>>, vector<1x128xf32>,
    %c0_i32_18 = arith.constant 0 : i32
    %31 = arith.cmpi eq, %arg1, %c0_i32_18 : i32
    %32 = arith.extui %31 : i1 to i32
    %c0_i32_19 = arith.constant 0 : i32
    %33 = arith.cmpi ne, %32, %c0_i32_19 : i32
    scf.if %33 {
      %c0_20 = arith.constant 0 : index
      %c0_21 = arith.constant 0 : index
      %34 = vector.load %arg9[%c0_20, %c0_21] : memref<1x128xf32, #tpu.memory_space<vmem>>, vector<1x128xf32>
      %cst_22 = arith.constant 3.906250e-03 : f32
      %35 = vector.broadcast %cst_22 : f32 to vector<1x128xf32>
      %36 = arith.mulf %34, %35 : vector<1x128xf32>
      %c0_23 = arith.constant 0 : index
      %c0_24 = arith.constant 0 : index
      %37 = vector.load %arg6[%c0_23, %c0_24] : memref<128x128xf32, #tpu.memory_space<vmem>>, vector<128x128xf32>
      %cst_25 = arith.constant dense<0.000000e+00> : vector<1x128xf32>
      %38 = tpu.matmul %36, %37, %cst_25 {dimension_numbers = #tpu.dot_dimension_numbers<[1], [0], [0], [1], [0, 0, 1, 1], [], []>} : vector<1x128xf32>, vector<128x128xf32>, vector<1x128xf32> -> vector<1x128xf32>
      %c0_26 = arith.constant 0 : index
      %c0_27 = arith.constant 0 : index
      %39 = vector.load %arg7[%c0_26, %c0_27] : memref<1x128xf32, #tpu.memory_space<vmem>>, vector<1x128xf32>
      %40 = arith.addf %38, %39 : vector<1x128xf32>
      %41 = vector.shape_cast %40 : vector<1x128xf32> to vector<1x1x128xf32>
      %c0_28 = arith.constant 0 : index
      %c0_29 = arith.constant 0 : index
      %c0_30 = arith.constant 0 : index
      %42 = vector.load %arg8[%c0_28, %c0_29, %c0_30] : memref<1x1x128xf32, #tpu.memory_space<vmem>>, vector<1x1x128xf32>
      tpu.vector_store %arg8[%c0_28, %c0_29, %c0_30], %41 {strides = array<i32>} : memref<1x1x128xf32, #tpu.memory_space<vmem>>, vector<1x1x128xf32>,
    } else {
    }
    return
  }
  func.func @transform_0(%arg0: i32, %arg1: i32) -> (i32, i32, i32) {
    %c0_i32 = arith.constant 0 : i32
    %c0_i32_0 = arith.constant 0 : i32
    return %arg0, %arg1, %c0_i32 : i32, i32, i32
  }
  func.func @transform_1(%arg0: i32, %arg1: i32) -> (i32, i32, i32) {
    %c1_i32 = arith.constant 1 : i32
    %0 = arith.addi %arg1, %c1_i32 : i32
    %c8_i32 = arith.constant 8 : i32
    %1 = arith.muli %0, %c8_i32 : i32
    %c0_i32 = arith.constant 0 : i32
    %c0_i32_0 = arith.constant 0 : i32
    return %arg0, %1, %c0_i32 : i32, i32, i32
  }
  func.func @transform_2(%arg0: i32, %arg1: i32) -> (i32, i32) {
    %c0_i32 = arith.constant 0 : i32
    %c0_i32_0 = arith.constant 0 : i32
    %c0_i32_1 = arith.constant 0 : i32
    return %c0_i32, %c0_i32_0 : i32, i32
  }
  func.func @transform_3(%arg0: i32, %arg1: i32) -> (i32, i32) {
    %c0_i32 = arith.constant 0 : i32
    %c0_i32_0 = arith.constant 0 : i32
    %c0_i32_1 = arith.constant 0 : i32
    return %c0_i32, %c0_i32_0 : i32, i32
  }
  func.func @transform_4(%arg0: i32, %arg1: i32) -> (i32, i32) {
    %c0_i32 = arith.constant 0 : i32
    %c0_i32_0 = arith.constant 0 : i32
    %c0_i32_1 = arith.constant 0 : i32
    return %c0_i32, %c0_i32_0 : i32, i32
  }
  func.func @transform_5(%arg0: i32, %arg1: i32) -> (i32, i32) {
    %c0_i32 = arith.constant 0 : i32
    %c0_i32_0 = arith.constant 0 : i32
    %c0_i32_1 = arith.constant 0 : i32
    return %c0_i32, %c0_i32_0 : i32, i32
  }
  func.func @transform_6(%arg0: i32, %arg1: i32) -> (i32, i32, i32) {
    %c0_i32 = arith.constant 0 : i32
    %c0_i32_0 = arith.constant 0 : i32
    %c0_i32_1 = arith.constant 0 : i32
    return %arg0, %c0_i32, %c0_i32_0 : i32, i32, i32
  }
}

</mosaic_0001>

<bundles_post_ra>
// kernel: network_forward.1
= control target key start
LH: loop header
LB: loop body
LE: loop exit
PB: predicated region body
PF: predicated region fallthrough
CT: control target
= control target key end

     0   :  { %11 = vsyncpa [#allocation4], 0  ;;  %s4300_s0 = inlined_call_operand.vmem [shape: bf16[2,576,16], index: 0, kind: input, shape index: {}, may-alias: {0,1}]   ;;  %s4301_s1 = inlined_call_operand.vmem [shape: bf16[2,576,16], index: 1, kind: input, shape index: {}, may-alias: {0,1}]   ;;  %s4302_s2 = inlined_call_operand.vmem [shape: bf16[48,128], index: 2, kind: input, shape index: {}]   ;;  %s4303_s3 = inlined_call_operand.vmem [shape: f32[1,128], index: 3, kind: input, shape index: {}]   ;;  %s4304_s4 = inlined_call_operand.vmem [shape: f32[128,128], index: 4, kind: input, shape index: {}]   ;;  %s4305_s5 = inlined_call_operand.vmem [shape: f32[1,128], index: 5, kind: input, shape index: {}]   ;;  %s4306_s6 = inlined_call_operand.hbm [shape: f32[2,1,128], index: 6, kind: output, shape index: {}]  }
   0x1   :  { %13 = vsyncpa [#allocation4 + $0x1], 0  ;;  %s3030_s21 = smov 0   ;;  %s3032_s22 = smov 0  }
   0x2   :  { %s3034_s23 = smov 0   ;;  %s3036_s24 = smov 0  }
   0x3   :  { %s3038_s25 = smov 0   ;;  %s3040_s26 = smov 0  }
   0x4 LB: > { %s2507_s27 = sadd.s32 4294967295, %s2985_s26   ;;  %s2508_s28 = sadd.s32 4294967294, %s2985_s26   ;;  %s2985_s26 = sphi %s3040_s26, %s19_s26   ;;  %s2981_s25 = sphi %s3038_s25, %s4382_s25   ;;  %s2977_s24 = sphi %s3036_s24, %s4381_s24   ;;  %s2973_s23 = sphi %s3034_s23, %s4380_s23   ;;  %s2969_s22 = sphi %s3032_s22, %s4379_s22   ;;  %s2965_s21 = sphi %s3030_s21, %s4378_s21  }
   0x5   : > { %s31_s29 = sadd.s32 1, %s2981_s25  ;;  %s182_s30 = sadd.s32 1, %s2973_s23 }
   0x6   : > { %p33_p0 = scmp.ge.s32.totalorder %s31_s29, 2  ;;  %p192_p1 = scmp.ne.s32.totalorder %s2973_s23, %s2969_s22 }
   0x7   : > { %p193_p2 = scmp.eq.s32.totalorder %s2507_s27, 1  ;;  %p198_p3 = scmp.ne.s32.totalorder %s2969_s22, %s2965_s21 }
   0x8   : > { %s4384_s29 = smov (%p33_p0, %s31_s29), 0  ;;  %p199_p5 = scmp.eq.s32.totalorder %s2508_s28, 1 }
   0x9   : > { %p3070_p4 = por %p193_p2, %p192_p1  ;;  %s179_s8 = ssub.s32 %s2981_s25, %s4384_s29 }
   0xa   : > { %p2511_p6 = scmp.ge.s32.totalorder %s2985_s26, 1  ;;  %p180_p7 = scmp.eq.s32.totalorder %s179_s8, 0 }
   0xb   : > { %p3077_p8 = por %p199_p5, %p198_p3  ;;  %p267_p9 = scmp.lt.s32.totalorder %s2985_s26, 3 }
   0xc   : > { %s3083_s10 = scalar_select %p180_p7, %s2973_s23, %s182_s30  }
   0xd   : > { %p268_p10 = pnand %p2511_p6, %p267_p9 }
   0xf   : > { %271 = sbr.rel (%p268_p10) target bundleno = 919 (0x397), region = 44 }
  0x16   : > { %p320_p11 = scmp.lt.s32.totalorder %s2977_s24, 1  ;;  %v2875_v0 = vld [vmem:[%s4302_s2] sm:$0xff]   ;;  %v2876_v1 = vld [vmem:[%s4302_s2 + $0x8] sm:$0xff]   ;;  %v2880_v2 = vld [vmem:[%s4302_s2 + $0x10] sm:$0xff]   ;;  %v4307_v3 = vmov 0   ;;  %s2988_s28 = smov 32  }
  0x17   : > { %2643 = vmatprep.subr.bf16.mxu0 %v2875_v0  ;;  %2772 = vmatprep.subr.bf16.mxu1 %v2875_v0  ;;  %s2989_s30 = smov 16   ;;  %vm735_vm0 = vcmask 130048   ;;  %vm832_vm3 = vcmask 261120   ;;  %vm928_vm4 = vcmask 392192   ;;  %s2586_s12 = sshll.u32 %s2977_s24, 4 }
  0x18   : > { %s3090_s13 = scalar_select %p320_p11, %s2977_s24, 1  ;;  %2644 = vmatpush3.bf16.msra.mxu0 %v2875_v0  ;;  %2775 = vmatpush3.bf16.msra.mxu1 %v2875_v0 }
  0x19   : > { %2645 = vmatprep.subr.bf16.mxu0 %v2876_v1  ;;  %2773 = vmatprep.subr.bf16.mxu1 %v2876_v1  ;;  %s4253_s17 = scalar_lea.hbm %s4306_s6, %s2586_s12  ;;  %s2994_s24 = smov [#allocation3]  }
  0x1a   : > { %s2778_s16 = smul.u32 288, %s3090_s13  ;;  %2844 = vset.pattern.permute.xlu1 %v4307_v3  ;;  %2843 = vset.pattern.permute.xlu0 %v4307_v3  ;;  %s2990_s13 = smov 116  }
  0x1b   : > { %s2911_s20 = sshll.u32 %s2994_s24, 4  ;;  %s2912_s20 = int_to_ptr.vmem [resolvable:$false] %s2911_s20 }
  0x1c   : > { %s3104_s27 = scalar_lea.vmem %s4300_s0, %s2778_s16  ;;  %2646 = vmatpush3.bf16.msra.mxu0 %v2876_v1  ;;  %2776 = vmatpush3.bf16.msra.mxu1 %v2876_v1  ;;  %s2590_s8 = sadd.s32 256, %s2778_s16 }
  0x1d   : > { %v3109_v4 = vld [vmem:[%s3104_s27 + $0x20] sm:$0xf]  ;;  %v3112_v5 = vld [vmem:[%s3104_s27 + $0x24] sm:$0xf]  ;;  %v3115_v6 = vld [vmem:[%s3104_s27 + $0x10] sm:$0xf]  ;;  %2647 = vmatprep.subr.bf16.mxu0 %v2880_v2  ;;  %2774 = vmatprep.subr.bf16.mxu1 %v2880_v2  ;;  %s3229_s14 = scalar_lea.vmem %s4301_s1, %s2590_s8 }
  0x1e   : > { %v3119_v7 = vcombine.low %v3109_v4, %v3112_v5  ;;  %v3122_v8 = vld [vmem:[%s3104_s27 + $0x14] sm:$0xf]  ;;  %v3125_v9 = vld [vmem:[%s3104_s27 + $0x28] sm:$0xf]  ;;  %v3132_v11 = vld [vmem:[%s3104_s27 + $0x2c] sm:$0xf] }
  0x1f   : > { %v3129_v10 = vcombine.low %v3115_v6, %v3122_v8  ;;  %v3135_v12 = vld [vmem:[%s3104_s27 + $0x18] sm:$0xf]  ;;  %v3141_v13 = vcombine.low %v3125_v9, %v3132_v11  ;;  %v3144_v14 = vld [vmem:[%s3104_s27 + $0x1c] sm:$0xf]  ;;  %v3163_v18 = vld [vmem:[%s3104_s27 + $0x30] sm:$0xf] }
  0x20   : > { %671 = vrot.lane.b32.xlu1 %v3119_v7, %s2988_s28  ;;  %v3150_v15 = vcombine.low %v3135_v12, %v3144_v14  ;;  %2648 = vmatpush3.bf16.msra.mxu0 %v2880_v2  ;;  %v3157_v16 = vld [vmem:[%s3104_s27 + $0x38] sm:$0xf]  ;;  %v3160_v17 = vld [vmem:[%s3104_s27 + $0x3c] sm:$0xf]  ;;  %v3166_v19 = vld [vmem:[%s3104_s27 + $0x34] sm:$0xf] }
  0x21   : > { %607 = vrot.lane.b32.xlu0 %v3129_v10, %s2989_s30  ;;  %2777 = vmatpush3.bf16.msra.mxu1 %v2880_v2  ;;  %v3172_v20 = vcombine.low %v3157_v16, %v3160_v17  ;;  %v3178_v21 = vcombine.low %v3163_v18, %v3166_v19  ;;  %v3185_v22 = vld [vmem:[%s3104_s27 + $0x48] sm:$0xf]  ;;  %v3188_v23 = vld [vmem:[%s3104_s27 + $0x4c] sm:$0xf]  ;;  %v3191_v24 = vld [vmem:[%s3104_s27 + $0x40] sm:$0xf] }
  0x22   : > { %v3194_v25 = vld [vmem:[%s3104_s27 + $0x44] sm:$0xf]  ;;  %v3200_v26 = vcombine.low %v3185_v22, %v3188_v23  ;;  %v3215_v28 = vld [vmem:[%s3104_s27 + $0x58] sm:$0xf]  ;;  %v3218_v29 = vld [vmem:[%s3104_s27 + $0x5c] sm:$0xf] }
  0x23   : > { %v3206_v27 = vcombine.low %v3191_v24, %v3194_v25  ;;  %v3221_v30 = vld [vmem:[%s3104_s27 + $0x50] sm:$0xf]  ;;  %v3224_v31 = vld [vmem:[%s3104_s27 + $0x54] sm:$0xf]  ;;  %v3235_v32 = vcombine.low %v3215_v28, %v3218_v29  ;;  %v3248_v34 = vld [vmem:[%s3104_s27 + $0x68] sm:$0xf] }
  0x24   : > { %673 = vrot.lane.b32.xlu1 %v3141_v13, %s2988_s28  ;;  %v3241_v33 = vcombine.low %v3221_v30, %v3224_v31  ;;  %v3251_v35 = vld [vmem:[%s3104_s27 + $0x6c] sm:$0xf]  ;;  %v3254_v36 = vld [vmem:[%s3104_s27 + $0x60] sm:$0xf]  ;;  %v3257_v37 = vld [vmem:[%s3104_s27 + $0x64] sm:$0xf] }
  0x25   : > { %609 = vrot.lane.b32.xlu0 %v3150_v15, %s2989_s30  ;;  %v3263_v38 = vcombine.low %v3248_v34, %v3251_v35  ;;  %v3269_v39 = vcombine.low %v3254_v36, %v3257_v37  ;;  %v3276_v40 = vld [vmem:[%s3104_s27 + $0x78] sm:$0xf]  ;;  %v3279_v41 = vld [vmem:[%s3104_s27 + $0x7c] sm:$0xf]  ;;  %v3282_v42 = vld [vmem:[%s3104_s27 + $0x70] sm:$0xf] }
  0x26   : > { %v3285_v43 = vld [vmem:[%s3104_s27 + $0x74] sm:$0xf]  ;;  %v3291_v44 = vcombine.low %v3276_v40, %v3279_v41  ;;  %v3304_v46 = vld [vmem:[%s3104_s27 + $0x88] sm:$0xf]  ;;  %v3307_v47 = vld [vmem:[%s3104_s27 + $0x8c] sm:$0xf] }
  0x27   : > { %v3297_v45 = vcombine.low %v3282_v42, %v3285_v43  ;;  %4333 = vst [vmem:[#allocation6_spill] sm:$0xff] %v3304_v46  ;;  %4334 = vst [vmem:[#allocation7_spill] sm:$0xff] %v3307_v47  ;;  %v3310_v48 = vld [vmem:[%s3104_s27 + $0x80] sm:$0xf]  ;;  %v3313_v49 = vld [vmem:[%s3104_s27 + $0x84] sm:$0xf]  ;;  %v3319_v50 = vcombine.low %v3304_v46, %v3307_v47 }
  0x28   : > { %613 = vrot.lane.b32.xlu1 %v3141_v13, %s2989_s30  ;;  %4335 = vst [vmem:[#allocation8_spill] sm:$0xff] %v3310_v48  ;;  %4336 = vst [vmem:[#allocation9_spill] sm:$0xff] %v3313_v49  ;;  %v3325_v51 = vcombine.low %v3310_v48, %v3313_v49  ;;  %v3332_v52 = vld [vmem:[%s3104_s27 + $0x98] sm:$0xf]  ;;  %v3335_v53 = vld [vmem:[%s3104_s27 + $0x9c] sm:$0xf] }
  0x29   : > { %611 = vrot.lane.b32.xlu0 %v3119_v7, %s2989_s30  ;;  %4337 = vst [vmem:[#allocation10_spill] sm:$0xff] %v3332_v52  ;;  %4338 = vst [vmem:[#allocation11_spill] sm:$0xff] %v3335_v53  ;;  %v3338_v54 = vld [vmem:[%s3104_s27 + $0x90] sm:$0xf]  ;;  %v3341_v55 = vld [vmem:[%s3104_s27 + $0x94] sm:$0xf]  ;;  %v3347_v56 = vcombine.low %v3332_v52, %v3335_v53 }
  0x2a   : > { %4339 = vst [vmem:[#allocation12_spill] sm:$0xff] %v3338_v54  ;;  %4340 = vst [vmem:[#allocation13_spill] sm:$0xff] %v3341_v55  ;;  %v3353_v57 = vcombine.low %v3338_v54, %v3341_v55  ;;  %v397_v58 = vld [vmem:[%s3104_s27 + $0xa8] sm:$0xf]  ;;  %v398_v59 = vld [vmem:[%s3104_s27 + $0xac] sm:$0xf] }
  0x2b   : > { %v3362_v60 = vld [vmem:[%s3104_s27 + $0xa0] sm:$0xf]  ;;  %v3365_v61 = vld [vmem:[%s3104_s27 + $0xa4] sm:$0xf]  ;;  %v3369_v62 = vcombine.low %v397_v58, %v398_v59  ;;  %v401_v0 = vld [vmem:[%s3104_s27 + $0xb8] sm:$0xf] }
  0x2c   : > { %677 = vrot.lane.b32.xlu1 %v3172_v20, %s2988_s28  ;;  %4341 = vst [vmem:[#allocation14_spill] sm:$0xff] %v3362_v60  ;;  %4342 = vst [vmem:[#allocation15_spill] sm:$0xff] %v3365_v61  ;;  %v3375_v63 = vcombine.low %v3362_v60, %v3365_v61  ;;  %v402_v1 = vld [vmem:[%s3104_s27 + $0xbc] sm:$0xf]  ;;  %v399_v2 = vld [vmem:[%s3104_s27 + $0xb0] sm:$0xf] }
  0x2d   : > { %675 = vrot.lane.b32.xlu0 %v3178_v21, %s2988_s28  ;;  %4343 = vst [vmem:[#allocation16_spill] sm:$0xff] %v3369_v62  ;;  %v400_v58 = vld [vmem:[%s3104_s27 + $0xb4] sm:$0xf]  ;;  %v3387_v59 = vcombine.low %v401_v0, %v402_v1  ;;  %v405_v61 = vld [vmem:[%s3104_s27 + $0xc8] sm:$0xf]  ;;  %vm1351_vm7 = vcmp.gt.bf16.partialorder %v3122_v8, 0 }
  0x2e   : > { %4344 = vst [vmem:[#allocation17_spill] sm:$0xff] %v3375_v63  ;;  %v3391_v3 = vcombine.low %v399_v2, %v400_v58  ;;  %v406_v60 = vld [vmem:[%s3104_s27 + $0xcc] sm:$0xf]  ;;  %v403_v53 = vld [vmem:[%s3104_s27 + $0xc0] sm:$0xf]  ;;  %vm1350_vm8 = vcmp.gt.bf16.partialorder %v3115_v6, 0 }
  0x2f   : > { %4345 = vst [vmem:[#allocation18_spill] sm:$0xff] %v3387_v59  ;;  %v404_v52 = vld [vmem:[%s3104_s27 + $0xc4] sm:$0xf]  ;;  %v3403_v0 = vcombine.low %v405_v61, %v406_v60  ;;  %v409_v2 = vld [vmem:[%s3104_s27 + $0xd8] sm:$0xf]  ;;  %vm1353_vm11 = vcmp.gt.bf16.partialorder %v3144_v14, 0 }
  0x30   : > { %617 = vrot.lane.b32.xlu1 %v3172_v20, %s2989_s30  ;;  %4346 = vst [vmem:[#allocation19_spill] sm:$0xff] %v3391_v3  ;;  %v3407_v1 = vcombine.low %v403_v53, %v404_v52  ;;  %v410_v58 = vld [vmem:[%s3104_s27 + $0xdc] sm:$0xf]  ;;  %v407_v55 = vld [vmem:[%s3104_s27 + $0xd0] sm:$0xf]  ;;  %vm1352_vm12 = vcmp.gt.bf16.partialorder %v3135_v12, 0 }
  0x31   : > { %615 = vrot.lane.b32.xlu0 %v3178_v21, %s2989_s30  ;;  %4347 = vst [vmem:[#allocation20_spill] sm:$0xff] %v3403_v0  ;;  %v408_v54 = vld [vmem:[%s3104_s27 + $0xd4] sm:$0xf]  ;;  %v3419_v60 = vcombine.low %v409_v2, %v410_v58  ;;  %v413_v53 = vld [vmem:[%s3104_s27 + $0xe8] sm:$0xf]  ;;  %vm1355_vm15 = vcmp.gt.bf16.partialorder %v3112_v5, 0 }
  0x32   : > { %4348 = vst [vmem:[#allocation21_spill] sm:$0xff] %v3407_v1  ;;  %v3423_v52 = vcombine.low %v407_v55, %v408_v54  ;;  %v414_v61 = vld [vmem:[%s3104_s27 + $0xec] sm:$0xf]  ;;  %v411_v47 = vld [vmem:[%s3104_s27 + $0xe0] sm:$0xf] }
  0x33   : > { %4349 = vst [vmem:[#allocation22_spill] sm:$0xff] %v3419_v60  ;;  %v412_v46 = vld [vmem:[%s3104_s27 + $0xe4] sm:$0xf]  ;;  %v3435_v2 = vcombine.low %v413_v53, %v414_v61  ;;  %v417_v55 = vld [vmem:[%s3104_s27 + $0xf8] sm:$0xf] }
  0x34   : > { %681 = vrot.lane.b32.xlu1 %v3200_v26, %s2988_s28  ;;  %4350 = vst [vmem:[#allocation23_spill] sm:$0xff] %v3423_v52  ;;  %v3439_v54 = vcombine.low %v411_v47, %v412_v46  ;;  %v418_v58 = vld [vmem:[%s3104_s27 + $0xfc] sm:$0xf]  ;;  %v415_v49 = vld [vmem:[%s3104_s27 + $0xf0] sm:$0xf] }
  0x35   : > { %679 = vrot.lane.b32.xlu0 %v3206_v27, %s2988_s28  ;;  %4351 = vst [vmem:[#allocation24_spill] sm:$0xff] %v3435_v2  ;;  %v416_v48 = vld [vmem:[%s3104_s27 + $0xf4] sm:$0xf]  ;;  %v3451_v53 = vcombine.low %v417_v55, %v418_v58  ;;  %v355_v47 = vld [vmem:[%s3104_s27] sm:$0xf]  ;;  %v2878_v55 = vld [vmem:[%s3229_s14 + $0x8] sm:$0xff]  }
  0x36   : > { %4352 = vst [vmem:[#allocation25_spill] sm:$0xff] %v3439_v54  ;;  %v3455_v46 = vcombine.low %v415_v49, %v416_v48  ;;  %v356_v61 = vld [vmem:[%s3104_s27 + $0x4] sm:$0xf]  ;;  %v357_v49 = vld [vmem:[%s3104_s27 + $0x8] sm:$0xf]  ;;  %vm1346_vm2 = vcmp.gt.bf16.partialorder %v355_v47, 0 }
  0x37   : > { %4353 = vst [vmem:[#allocation26_spill] sm:$0xff] %v3451_v53  ;;  %vm1347_vm1 = vcmp.gt.bf16.partialorder %v356_v61, 0  ;;  %v2879_v48 = vld [vmem:[%s3229_s14] sm:$0xff]   ;;  %v358_v58 = vld [vmem:[%s3104_s27 + $0xc] sm:$0xf]  ;;  %vm1348_vm6 = vcmp.gt.bf16.partialorder %v357_v49, 0 }
  0x38   : > { %621 = vrot.lane.b32.xlu1 %v3200_v26, %s2989_s30  ;;  %4354 = vst [vmem:[#allocation27_spill] sm:$0xff] %v3455_v46  ;;  %vm1349_vm5 = vcmp.gt.bf16.partialorder %v358_v58, 0 }
  0x39   : > { %619 = vrot.lane.b32.xlu0 %v3206_v27, %s2989_s30 }
  0x3c   : > { %685 = vrot.lane.b32.xlu1 %v3235_v32, %s2988_s28 }
  0x3d   : > { %683 = vrot.lane.b32.xlu0 %v3241_v33, %s2988_s28 }
  0x40   : > { %625 = vrot.lane.b32.xlu1 %v3235_v32, %s2989_s30 }
  0x41   : > { %623 = vrot.lane.b32.xlu0 %v3241_v33, %s2989_s30 }
  0x44   : > { %689 = vrot.lane.b32.xlu1 %v3263_v38, %s2988_s28 }
  0x45   : > { %687 = vrot.lane.b32.xlu0 %v3269_v39, %s2988_s28 }
  0x48   : > { %629 = vrot.lane.b32.xlu1 %v3263_v38, %s2989_s30 }
  0x49   : > { %627 = vrot.lane.b32.xlu0 %v3269_v39, %s2989_s30 }
  0x4c   : > { %693 = vrot.lane.b32.xlu1 %v3291_v44, %s2988_s28 }
  0x4d   : > { %691 = vrot.lane.b32.xlu0 %v3297_v45, %s2988_s28 }
  0x50   : > { %633 = vrot.lane.b32.xlu1 %v3291_v44, %s2989_s30 }
  0x51   : > { %631 = vrot.lane.b32.xlu0 %v3297_v45, %s2989_s30 }
  0x54   : > { %697 = vrot.lane.b32.xlu1 %v3319_v50, %s2988_s28 }
  0x55   : > { %695 = vrot.lane.b32.xlu0 %v3325_v51, %s2988_s28 }
  0x58   : > { %637 = vrot.lane.b32.xlu1 %v3319_v50, %s2989_s30 }
  0x59   : > { %635 = vrot.lane.b32.xlu0 %v3325_v51, %s2989_s30 }
  0x5c   : > { %701 = vrot.lane.b32.xlu1 %v3347_v56, %s2988_s28 }
  0x5d   : > { %699 = vrot.lane.b32.xlu0 %v3353_v57, %s2988_s28 }
  0x60   : > { %641 = vrot.lane.b32.xlu1 %v3347_v56, %s2989_s30 }
  0x61   : > { %639 = vrot.lane.b32.xlu0 %v3353_v57, %s2989_s30 }
  0x64   : > { %705 = vrot.lane.b32.xlu1 %v3369_v62, %s2988_s28 }
  0x65   : > { %703 = vrot.lane.b32.xlu0 %v3375_v63, %s2988_s28 }
  0x68   : > { %645 = vrot.lane.b32.xlu1 %v3369_v62, %s2989_s30 }
  0x69   : > { %643 = vrot.lane.b32.xlu0 %v3375_v63, %s2989_s30 }
  0x6c   : > { %709 = vrot.lane.b32.xlu1 %v3387_v59, %s2988_s28 }
  0x6d   : > { %707 = vrot.lane.b32.xlu0 %v3391_v3, %s2988_s28 }
  0x70   : > { %649 = vrot.lane.b32.xlu1 %v3387_v59, %s2989_s30 }
  0x71   : > { %647 = vrot.lane.b32.xlu0 %v3391_v3, %s2989_s30 }
  0x74   : > { %713 = vrot.lane.b32.xlu1 %v3403_v0, %s2988_s28 }
  0x75   : > { %711 = vrot.lane.b32.xlu0 %v3407_v1, %s2988_s28 }
  0x78   : > { %653 = vrot.lane.b32.xlu1 %v3403_v0, %s2989_s30 }
  0x79   : > { %651 = vrot.lane.b32.xlu0 %v3407_v1, %s2989_s30 }
  0x7c   : > { %717 = vrot.lane.b32.xlu1 %v3419_v60, %s2988_s28 }
  0x7d   : > { %715 = vrot.lane.b32.xlu0 %v3423_v52, %s2988_s28 }
  0x80   : > { %657 = vrot.lane.b32.xlu1 %v3419_v60, %s2989_s30 }
  0x81   : > { %655 = vrot.lane.b32.xlu0 %v3423_v52, %s2989_s30  ;;  %v4355_v52 = vmov 0  }
  0x82   : > { %v1411_v0 = vsel %vm1347_vm1, 65537, %v4355_v52  ;;  %v1412_v63 = vsel %vm1348_vm6, 65537, %v4355_v52  ;;  %v1414_v6 = vsel %vm1350_vm8, 65537, %v4355_v52  ;;  %v1416_v12 = vsel %vm1352_vm12, 65537, %v4355_v52 }
  0x83   : > { %v1475_v59 = vunpack.c.l.b16 %v1411_v0  ;;  %v2883_v0 = vld [vmem:[%s3229_s14 + $0x10] sm:$0xff]   ;;  %vm1354_vm1 = vcmp.gt.bf16.partialorder %v3109_v4, 0  ;;  %v1419_v5 = vsel %vm1355_vm15, 65537, %v4355_v52  ;;  %vm1357_vm6 = vcmp.gt.bf16.partialorder %v3132_v11, 0 }
  0x84   : > { %721 = vrot.lane.b32.xlu1 %v3435_v2, %s2988_s28  ;;  %vm1360_vm15 = vcmp.gt.bf16.partialorder %v3157_v16, 0 }
  0x85   : > { %719 = vrot.lane.b32.xlu0 %v3439_v54, %s2988_s28  ;;  %vm1539_vm9 = vcmp.ne.s32.totalorder %v1475_v59, 0  ;;  %v1424_v16 = vsel %vm1360_vm15, 65537, %v4355_v52 }
  0x86   : > { %v1603_v59 = vsel %vm1539_vm9, 1, %v4355_v52 }
  0x88   : > { %661 = vrot.lane.b32.xlu1 %v3435_v2, %s2989_s30  ;;  %v2514_v2 = vcombine.low %v355_v47, %v356_v61  ;;  %v1410_v61 = vsel %vm1346_vm2, 65537, %v4355_v52 }
  0x89   : > { %659 = vrot.lane.b32.xlu0 %v3439_v54, %s2989_s30  ;;  %v1474_v62 = vunpack.c.l.b16 %v1410_v61 }
  0x8b   : > { %vm1538_vm10 = vcmp.ne.s32.totalorder %v1474_v62, 0 }
  0x8c   : > { %725 = vrot.lane.b32.xlu1 %v3451_v53, %s2988_s28 }
  0x8d   : > { %723 = vrot.lane.b32.xlu0 %v3455_v46, %s2988_s28 }
  0x90   : > { %665 = vrot.lane.b32.xlu1 %v3451_v53, %s2989_s30  ;;  %v2515_v53 = vcombine.low %v357_v49, %v358_v58  ;;  %v2882_v58 = vld [vmem:[%s3229_s14 + $0x18] sm:$0xff]  }
  0x91   : > { %663 = vrot.lane.b32.xlu0 %v3455_v46, %s2989_s30 }
  0x92   : > { %v672_v54 = vpop.permute.xlu1 %671 }
  0x93   : > { %v608_v60 = vpop.permute.xlu0 %607 }
  0x94   : > { %v738_v1 = vsel %vm735_vm0, %v2514_v2, %v608_v60  ;;  %729 = vrot.lane.b32.xlu1 %v2878_v55, %s2988_s28  ;;  %v1413_v60 = vsel %vm1349_vm5, 65537, %v4355_v52 }
  0x95   : > { %727 = vrot.lane.b32.xlu0 %v2879_v48, %s2988_s28  ;;  %v834_v46 = vsel %vm832_vm3, %v738_v1, %v672_v54 }
  0x96   : > { %2649 = vmatprep.mubr.msk.bf16.mxu0 %vm928_vm4, %v834_v46  ;;  %v674_v47 = vpop.permute.xlu1 %673  ;;  %v1477_v46 = vunpack.c.l.b16 %v1413_v60 }
  0x97   : > { %v610_v3 = vpop.permute.xlu0 %609 }
  0x98   : > { %v741_v2 = vsel %vm735_vm0, %v2515_v53, %v610_v3  ;;  %669 = vrot.lane.b32.xlu1 %v2878_v55, %s2989_s30  ;;  %v1476_v3 = vunpack.c.l.b16 %v1412_v63  ;;  %v1415_v53 = vsel %vm1351_vm7, 65537, %v4355_v52  ;;  %v1602_v63 = vsel %vm1538_vm10, 1, %v4355_v52 }
  0x99   : > { %667 = vrot.lane.b32.xlu0 %v2879_v48, %s2989_s30  ;;  %v836_v1 = vsel %vm832_vm3, %v741_v2, %v674_v47  ;;  %vm1541_vm13 = vcmp.ne.s32.totalorder %v1477_v46, 0  ;;  %v1479_v48 = vunpack.c.l.b16 %v1415_v53  ;;  %v1478_v47 = vunpack.c.l.b16 %v1414_v6  ;;  %s313_s30 = sand.u32 1, %s2969_s22  }
  0x9a   : > { %2650 = vmatmul.mubr.msk.bf16.vlgmr.msra.gmra.mrb[0].mxu0 %vm928_vm4, %v836_v1  ;;  %v614_v54 = vpop.permute.xlu1 %613  ;;  %vm1540_vm14 = vcmp.ne.s32.totalorder %v1476_v3, 0  ;;  %v1418_v46 = vsel %vm1354_vm1, 65537, %v4355_v52  ;;  %vm1356_vm7 = vcmp.gt.bf16.partialorder %v3125_v9, 0  ;;  %vm1359_vm10 = vcmp.gt.bf16.partialorder %v3166_v19, 0  ;;  %s314_s14 = scalar_lea.vmem [#allocation3], %s313_s30  ;;  %s2408_s18 = scalar_lea.sflag [#allocation4], %s313_s30 }
  0x9b   : > { %v612_v49 = vpop.permute.xlu0 %611  ;;  %v747_v62 = vsel %vm735_vm0, %v3150_v15, %v614_v54  ;;  %v1605_v15 = vsel %vm1541_vm13, 1, %v4355_v52  ;;  %vm1543_vm2 = vcmp.ne.s32.totalorder %v1479_v48, 0  ;;  %vm1542_vm5 = vcmp.ne.s32.totalorder %v1478_v47, 0 }
  0x9c   : > { %733 = vrot.lane.b32.xlu1 %v2882_v58, %s2988_s28  ;;  %v744_v55 = vsel %vm735_vm0, %v3129_v10, %v612_v49  ;;  %v1417_v10 = vsel %vm1353_vm11, 65537, %v4355_v52  ;;  %v1604_v58 = vsel %vm1540_vm14, 1, %v4355_v52  ;;  %v1480_v54 = vunpack.c.l.b16 %v1416_v12 }
  0x9d   : > { %731 = vrot.lane.b32.xlu0 %v2883_v0, %s2988_s28  ;;  %v1481_v1 = vunpack.c.l.b16 %v1417_v10  ;;  %v1607_v49 = vsel %vm1543_vm2, 1, %v4355_v52  ;;  %v1606_v6 = vsel %vm1542_vm5, 1, %v4355_v52  ;;  %v1420_v9 = vsel %vm1356_vm7, 65537, %v4355_v52 }
  0x9e   : > { %v678_v8 = vpop.permute.xlu1 %677  ;;  %vm1544_vm9 = vcmp.ne.s32.totalorder %v1480_v54, 0  ;;  %vm1358_vm11 = vcmp.gt.bf16.partialorder %v3163_v18, 0  ;;  %v1484_v47 = vunpack.c.l.b16 %v1420_v9  ;;  %v1423_v19 = vsel %vm1359_vm10, 65537, %v4355_v52 }
  0x9f   : > { %v840_v61 = vsel %vm832_vm3, %v747_v62, %v678_v8  ;;  %v676_v14 = vpop.permute.xlu0 %675  ;;  %vm1545_vm8 = vcmp.ne.s32.totalorder %v1481_v1, 0  ;;  %v1482_v62 = vunpack.c.l.b16 %v1418_v46  ;;  %v1608_v48 = vsel %vm1544_vm9, 1, %v4355_v52 }
  0xa0   : > { %v838_v60 = vsel %vm832_vm3, %v744_v55, %v676_v14  ;;  %1668 = vrot.lane.b32.xlu1 %v1603_v59, %s2990_s13  ;;  %v1483_v55 = vunpack.c.l.b16 %v1419_v5  ;;  %v1422_v10 = vsel %vm1358_vm11, 65537, %v4355_v52  ;;  %vm1361_vm14 = vcmp.gt.bf16.partialorder %v3160_v17, 0 }
  0xa1   : > { %1666 = vrot.lane.b32.xlu0 %v1602_v63, %s2990_s13  ;;  %2653 = vmatprep.mubr.msk.bf16.mxu0 %vm928_vm4, %v838_v60  ;;  %vm1546_vm13 = vcmp.ne.s32.totalorder %v1482_v62, 0  ;;  %vm1548_vm2 = vcmp.ne.s32.totalorder %v1484_v47, 0  ;;  %vm1363_vm5 = vcmp.gt.bf16.partialorder %v3194_v25, 0  ;;  %vm1365_vm9 = vcmp.gt.bf16.partialorder %v3188_v23, 0 }
  0xa2   : > { %2654 = vmatmul.mubr.msk.bf16.gmra.mrb[4].mxu0 %vm928_vm4, %v840_v61  ;;  %v618_v2 = vpop.permute.xlu1 %617  ;;  %vm1547_vm12 = vcmp.ne.s32.totalorder %v1483_v55, 0  ;;  %v1612_v46 = vsel %vm1548_vm2, 1, %v4355_v52  ;;  %v1427_v25 = vsel %vm1363_vm5, 65537, %v4355_v52  ;;  %vm1364_vm10 = vcmp.gt.bf16.partialorder %v3185_v22, 0 }
  0xa3   : > { %v616_v0 = vpop.permute.xlu0 %615  ;;  %v753_v3 = vsel %vm735_vm0, %v3141_v13, %v618_v2  ;;  %v1609_v13 = vsel %vm1545_vm8, 1, %v4355_v52  ;;  %v1611_v60 = vsel %vm1547_vm12, 1, %v4355_v52  ;;  %v1610_v2 = vsel %vm1546_vm13, 1, %v4355_v52 }
  0xa4   : > { %1672 = vrot.lane.b32.xlu1 %v1605_v15, %s2990_s13  ;;  %v750_v4 = vsel %vm735_vm0, %v3119_v7, %v616_v0  ;;  %v1421_v7 = vsel %vm1357_vm6, 65537, %v4355_v52  ;;  %v1486_v0 = vunpack.c.l.b16 %v1422_v10  ;;  %vm1362_vm6 = vcmp.gt.bf16.partialorder %v3191_v24, 0 }
  0xa5   : > { %1670 = vrot.lane.b32.xlu0 %v1604_v58, %s2990_s13  ;;  %v1485_v61 = vunpack.c.l.b16 %v1421_v7  ;;  %v1487_v58 = vunpack.c.l.b16 %v1423_v19  ;;  %v1491_v62 = vunpack.c.l.b16 %v1427_v25  ;;  %v1428_v22 = vsel %vm1364_vm10, 65537, %v4355_v52 }
  0xa6   : > { %v682_v53 = vpop.permute.xlu1 %681  ;;  %vm1550_vm8 = vcmp.ne.s32.totalorder %v1486_v0, 0  ;;  %vm1367_vm13 = vcmp.gt.bf16.partialorder %v3224_v31, 0  ;;  %vm1369_vm2 = vcmp.gt.bf16.partialorder %v3218_v29, 0  ;;  %vm1368_vm5 = vcmp.gt.bf16.partialorder %v3215_v28, 0 }
  0xa7   : > { %v844_v59 = vsel %vm832_vm3, %v753_v3, %v682_v53  ;;  %v680_v11 = vpop.permute.xlu0 %679  ;;  %vm1549_vm1 = vcmp.ne.s32.totalorder %v1485_v61, 0  ;;  %vm1551_vm7 = vcmp.ne.s32.totalorder %v1487_v58, 0  ;;  %v1488_v3 = vunpack.c.l.b16 %v1424_v16 }
  0xa8   : > { %v842_v8 = vsel %vm832_vm3, %v750_v4, %v680_v11  ;;  %1676 = vrot.lane.b32.xlu1 %v1607_v49, %s2990_s13  ;;  %v1426_v53 = vsel %vm1362_vm6, 65537, %v4355_v52  ;;  %v1614_v11 = vsel %vm1550_vm8, 1, %v4355_v52  ;;  %vm1555_vm15 = vcmp.ne.s32.totalorder %v1491_v62, 0 }
  0xa9   : > { %2657 = vmatprep.mubr.msk.bf16.mxu0 %vm928_vm4, %v842_v8  ;;  %1674 = vrot.lane.b32.xlu0 %v1606_v6, %s2990_s13  ;;  %v1615_v6 = vsel %vm1551_vm7, 1, %v4355_v52  ;;  %vm1552_vm12 = vcmp.ne.s32.totalorder %v1488_v3, 0  ;;  %v1490_v8 = vunpack.c.l.b16 %v1426_v53  ;;  %v1431_v31 = vsel %vm1367_vm13, 65537, %v4355_v52 }
  0xaa   : > { %2658 = vmatmul.mubr.msk.bf16.gmra.mrb[8].mxu0 %vm928_vm4, %v844_v59  ;;  %v622_v63 = vpop.permute.xlu1 %621  ;;  %v1619_v19 = vsel %vm1555_vm15, 1, %v4355_v52  ;;  %v1432_v28 = vsel %vm1368_vm5, 65537, %v4355_v52  ;;  %vm1371_vm8 = vcmp.gt.bf16.partialorder %v3257_v37, 0  ;;  %vm1372_vm13 = vcmp.gt.bf16.partialorder %v3248_v34, 0 }
  0xab   : > { %v620_v14 = vpop.permute.xlu0 %619  ;;  %v759_v12 = vsel %vm735_vm0, %v3172_v20, %v622_v63  ;;  %v1613_v20 = vsel %vm1549_vm1, 1, %v4355_v52  ;;  %v1616_v63 = vsel %vm1552_vm12, 1, %v4355_v52  ;;  %vm1554_vm1 = vcmp.ne.s32.totalorder %v1490_v8, 0 }
  0xac   : > { %1680 = vrot.lane.b32.xlu1 %v1609_v13, %s2990_s13  ;;  %v756_v18 = vsel %vm735_vm0, %v3178_v21, %v620_v14  ;;  %v1425_v21 = vsel %vm1361_vm14, 65537, %v4355_v52  ;;  %vm1366_vm14 = vcmp.gt.bf16.partialorder %v3221_v30, 0  ;;  %v1492_v14 = vunpack.c.l.b16 %v1428_v22 }
  0xad   : > { %1678 = vrot.lane.b32.xlu0 %v1608_v48, %s2990_s13  ;;  %v1489_v4 = vunpack.c.l.b16 %v1425_v21  ;;  %v1430_v47 = vsel %vm1366_vm14, 65537, %v4355_v52  ;;  %v1435_v37 = vsel %vm1371_vm8, 65537, %v4355_v52  ;;  %vm1373_vm12 = vcmp.gt.bf16.partialorder %v3251_v35, 0 }
  0xae   : > { %v686_v15 = vpop.permute.xlu1 %685  ;;  %vm1556_vm7 = vcmp.ne.s32.totalorder %v1492_v14, 0  ;;  %v1436_v34 = vsel %vm1372_vm13, 65537, %v4355_v52  ;;  %vm1376_vm8 = vcmp.gt.bf16.partialorder %v3276_v40, 0 }
  0xaf   : > { %v848_v1 = vsel %vm832_vm3, %v759_v12, %v686_v15  ;;  %v684_v17 = vpop.permute.xlu0 %683  ;;  %vm1553_vm11 = vcmp.ne.s32.totalorder %v1489_v4, 0  ;;  %v1495_v12 = vunpack.c.l.b16 %v1431_v31  ;;  %v1440_v40 = vsel %vm1376_vm8, 65537, %v4355_v52 }
  0xb0   : > { %v846_v54 = vsel %vm832_vm3, %v756_v18, %v684_v17  ;;  %1684 = vrot.lane.b32.xlu1 %v1611_v60, %s2990_s13  ;;  %v1618_v60 = vsel %vm1554_vm1, 1, %v4355_v52  ;;  %v1620_v17 = vsel %vm1556_vm7, 1, %v4355_v52  ;;  %vm1375_vm1 = vcmp.gt.bf16.partialorder %v3285_v43, 0 }
  0xb1   : > { %2661 = vmatprep.mubr.msk.bf16.mxu0 %vm928_vm4, %v846_v54  ;;  %1682 = vrot.lane.b32.xlu0 %v1610_v2, %s2990_s13  ;;  %v1494_v2 = vunpack.c.l.b16 %v1430_v47  ;;  %vm1559_vm10 = vcmp.ne.s32.totalorder %v1495_v12, 0  ;;  %v1496_v54 = vunpack.c.l.b16 %v1432_v28  ;;  %v1439_v43 = vsel %vm1375_vm1, 65537, %v4355_v52 }
  0xb2   : > { %2662 = vmatmul.mubr.msk.bf16.gmra.mrb[12].mxu0 %vm928_vm4, %v848_v1  ;;  %v626_v5 = vpop.permute.xlu1 %625  ;;  %vm1377_vm7 = vcmp.gt.bf16.partialorder %v3279_v41, 0  ;;  %v1504_v31 = vunpack.c.l.b16 %v1440_v40 }
  0xb3   : > { %v624_v49 = vpop.permute.xlu0 %623  ;;  %v765_v55 = vsel %vm735_vm0, %v3200_v26, %v626_v5  ;;  %v1617_v26 = vsel %vm1553_vm11, 1, %v4355_v52  ;;  %vm1558_vm11 = vcmp.ne.s32.totalorder %v1494_v2, 0  ;;  %vm1560_vm15 = vcmp.ne.s32.totalorder %v1496_v54, 0  ;;  %v4356_v54 = vld [vmem:[#allocation17_spill] sm:$0xff] }
  0xb4   : > { %1688 = vrot.lane.b32.xlu1 %v1613_v20, %s2990_s13  ;;  %v762_v24 = vsel %vm735_vm0, %v3206_v27, %v624_v49  ;;  %v1429_v27 = vsel %vm1365_vm9, 65537, %v4355_v52  ;;  %vm1370_vm9 = vcmp.gt.bf16.partialorder %v3254_v36, 0  ;;  %v1623_v20 = vsel %vm1559_vm10, 1, %v4355_v52 }
  0xb5   : > { %1686 = vrot.lane.b32.xlu0 %v1612_v46, %s2990_s13  ;;  %v1493_v48 = vunpack.c.l.b16 %v1429_v27  ;;  %v1434_v16 = vsel %vm1370_vm9, 65537, %v4355_v52  ;;  %v1622_v4 = vsel %vm1558_vm11, 1, %v4355_v52  ;;  %v1499_v49 = vunpack.c.l.b16 %v1435_v37  ;;  %v4357_v37 = vld [vmem:[#allocation16_spill] sm:$0xff] }
  0xb6   : > { %v690_v59 = vpop.permute.xlu1 %689  ;;  %v1498_v25 = vunpack.c.l.b16 %v1434_v16 }
  0xb7   : > { %v852_v7 = vsel %vm832_vm3, %v765_v55, %v690_v59  ;;  %v688_v23 = vpop.permute.xlu0 %687  ;;  %vm1557_vm6 = vcmp.ne.s32.totalorder %v1493_v48, 0  ;;  %vm1563_vm5 = vcmp.ne.s32.totalorder %v1499_v49, 0  ;;  %v4358_v49 = vld [vmem:[#allocation19_spill] sm:$0xff] }
  0xb8   : > { %v850_v9 = vsel %vm832_vm3, %v762_v24, %v688_v23  ;;  %1692 = vrot.lane.b32.xlu1 %v1615_v6, %s2990_s13  ;;  %v1624_v6 = vsel %vm1560_vm15, 1, %v4355_v52 }
  0xb9   : > { %2665 = vmatprep.mubr.msk.bf16.mxu0 %vm928_vm4, %v850_v9  ;;  %1690 = vrot.lane.b32.xlu0 %v1614_v11, %s2990_s13  ;;  %v1500_v11 = vunpack.c.l.b16 %v1436_v34  ;;  %v1503_v9 = vunpack.c.l.b16 %v1439_v43 }
  0xba   : > { %2666 = vmatmul.mubr.msk.bf16.gmra.mrb[16].mxu0 %vm928_vm4, %v852_v7  ;;  %v630_v13 = vpop.permute.xlu1 %629  ;;  %v1627_v7 = vsel %vm1563_vm5, 1, %v4355_v52 }
  0xbb   : > { %v628_v61 = vpop.permute.xlu0 %627  ;;  %v771_v10 = vsel %vm735_vm0, %v3235_v32, %v630_v13  ;;  %v1621_v32 = vsel %vm1557_vm6, 1, %v4355_v52  ;;  %vm1562_vm6 = vcmp.ne.s32.totalorder %v1498_v25, 0  ;;  %vm1564_vm10 = vcmp.ne.s32.totalorder %v1500_v11, 0  ;;  %v4361_v11 = vld [vmem:[#allocation20_spill] sm:$0xff] }
  0xbc   : > { %1696 = vrot.lane.b32.xlu1 %v1617_v26, %s2990_s13  ;;  %v768_v30 = vsel %vm735_vm0, %v3241_v33, %v628_v61  ;;  %v1433_v33 = vsel %vm1369_vm2, 65537, %v4355_v52  ;;  %vm1374_vm2 = vcmp.gt.bf16.partialorder %v3282_v42, 0  ;;  %v1626_v27 = vsel %vm1562_vm6, 1, %v4355_v52 }
  0xbd   : > { %1694 = vrot.lane.b32.xlu0 %v1616_v63, %s2990_s13  ;;  %v1497_v0 = vunpack.c.l.b16 %v1433_v33  ;;  %v1438_v62 = vsel %vm1374_vm2, 65537, %v4355_v52  ;;  %v1628_v48 = vsel %vm1564_vm10, 1, %v4355_v52  ;;  %vm1567_vm11 = vcmp.ne.s32.totalorder %v1503_v9, 0  ;;  %v4362_v9 = vld [vmem:[#allocation23_spill] sm:$0xff] }
  0xbe   : > { %v694_v18 = vpop.permute.xlu1 %693  ;;  %v1502_v26 = vunpack.c.l.b16 %v1438_v62 }
  0xbf   : > { %v856_v15 = vsel %vm832_vm3, %v771_v10, %v694_v18  ;;  %v692_v29 = vpop.permute.xlu0 %691  ;;  %vm1561_vm14 = vcmp.ne.s32.totalorder %v1497_v0, 0 }
  0xc0   : > { %v854_v58 = vsel %vm832_vm3, %v768_v30, %v692_v29  ;;  %1700 = vrot.lane.b32.xlu1 %v1619_v19, %s2990_s13  ;;  %v1631_v30 = vsel %vm1567_vm11, 1, %v4355_v52 }
  0xc1   : > { %2669 = vmatprep.mubr.msk.bf16.mxu0 %vm928_vm4, %v854_v58  ;;  %1698 = vrot.lane.b32.xlu0 %v1618_v60, %s2990_s13 }
  0xc2   : > { %2670 = vmatmul.mubr.msk.bf16.gmra.mrb[20].mxu0 %vm928_vm4, %v856_v15  ;;  %v634_v1 = vpop.permute.xlu1 %633 }
  0xc3   : > { %v632_v21 = vpop.permute.xlu0 %631  ;;  %v777_v5 = vsel %vm735_vm0, %v3263_v38, %v634_v1  ;;  %v1625_v38 = vsel %vm1561_vm14, 1, %v4355_v52  ;;  %vm1568_vm14 = vcmp.ne.s32.totalorder %v1504_v31, 0  ;;  %v4365_v31 = vld [vmem:[#allocation24_spill] sm:$0xff] }
  0xc4   : > { %1704 = vrot.lane.b32.xlu1 %v1621_v32, %s2990_s13  ;;  %v774_v36 = vsel %vm735_vm0, %v3269_v39, %v632_v21  ;;  %v1437_v39 = vsel %vm1373_vm12, 65537, %v4355_v52  ;;  %vm1566_vm12 = vcmp.ne.s32.totalorder %v1502_v26, 0  ;;  %v1632_v29 = vsel %vm1568_vm14, 1, %v4355_v52 }
  0xc5   : > { %1702 = vrot.lane.b32.xlu0 %v1620_v17, %s2990_s13  ;;  %v1501_v55 = vunpack.c.l.b16 %v1437_v39  ;;  %v1630_v18 = vsel %vm1566_vm12, 1, %v4355_v52 }
  0xc6   : > { %v698_v46 = vpop.permute.xlu1 %697 }
  0xc7   : > { %v860_v3 = vsel %vm832_vm3, %v777_v5, %v698_v46  ;;  %v696_v35 = vpop.permute.xlu0 %695  ;;  %vm1565_vm9 = vcmp.ne.s32.totalorder %v1501_v55, 0  ;;  %v4360_v55 = vld [vmem:[#allocation21_spill] sm:$0xff] }
  0xc8   : > { %v858_v53 = vsel %vm832_vm3, %v774_v36, %v696_v35  ;;  %1708 = vrot.lane.b32.xlu1 %v1623_v20, %s2990_s13  ;;  %v4359_v35 = vld [vmem:[#allocation18_spill] sm:$0xff] }
  0xc9   : > { %2673 = vmatprep.mubr.msk.bf16.mxu0 %vm928_vm4, %v858_v53  ;;  %1706 = vrot.lane.b32.xlu0 %v1622_v4, %s2990_s13 }
  0xca   : > { %2674 = vmatmul.mubr.msk.bf16.gmra.mrb[24].mxu0 %vm928_vm4, %v860_v3  ;;  %v638_v24 = vpop.permute.xlu1 %637 }
  0xcb   : > { %v636_v59 = vpop.permute.xlu0 %635  ;;  %v783_v23 = vsel %vm735_vm0, %v3291_v44, %v638_v24  ;;  %v1629_v44 = vsel %vm1565_vm9, 1, %v4355_v52 }
  0xcc   : > { %1712 = vrot.lane.b32.xlu1 %v1625_v38, %s2990_s13  ;;  %v780_v42 = vsel %vm735_vm0, %v3297_v45, %v636_v59  ;;  %v1441_v45 = vsel %vm1377_vm7, 65537, %v4355_v52 }
  0xcd   : > { %1710 = vrot.lane.b32.xlu0 %v1624_v6, %s2990_s13  ;;  %v1505_v61 = vunpack.c.l.b16 %v1441_v45 }
  0xce   : > { %v702_v8 = vpop.permute.xlu1 %701 }
  0xcf   : > { %v864_v22 = vsel %vm832_vm3, %v783_v23, %v702_v8  ;;  %v700_v41 = vpop.permute.xlu0 %699  ;;  %vm1569_vm13 = vcmp.ne.s32.totalorder %v1505_v61, 0  ;;  %v4364_v61 = vld [vmem:[#allocation25_spill] sm:$0xff] }
  0xd0   : > { %v862_v13 = vsel %vm832_vm3, %v780_v42, %v700_v41  ;;  %1716 = vrot.lane.b32.xlu1 %v1627_v7, %s2990_s13  ;;  %v4363_v41 = vld [vmem:[#allocation22_spill] sm:$0xff] }
  0xd1   : > { %2677 = vmatprep.mubr.msk.bf16.mxu0 %vm928_vm4, %v862_v13  ;;  %1714 = vrot.lane.b32.xlu0 %v1626_v27, %s2990_s13 }
  0xd2   : > { %2678 = vmatmul.mubr.msk.bf16.gmra.mrb[28].mxu0 %vm928_vm4, %v864_v22  ;;  %v642_v63 = vpop.permute.xlu1 %641 }
  0xd3   : > { %v640_v14 = vpop.permute.xlu0 %639  ;;  %v789_v19 = vsel %vm735_vm0, %v3319_v50, %v642_v63 }
  0xd4   : > { %1720 = vrot.lane.b32.xlu1 %v1629_v44, %s2990_s13  ;;  %v786_v47 = vsel %vm735_vm0, %v3325_v51, %v640_v14  ;;  %v1633_v51 = vsel %vm1569_vm13, 1, %v4355_v52 }
  0xd5   : > { %1718 = vrot.lane.b32.xlu0 %v1628_v48, %s2990_s13 }
  0xd6   : > { %v706_v10 = vpop.permute.xlu1 %705 }
  0xd7   : > { %v868_v60 = vsel %vm832_vm3, %v789_v19, %v706_v10  ;;  %v704_v12 = vpop.permute.xlu0 %703 }
  0xd8   : > { %v866_v15 = vsel %vm832_vm3, %v786_v47, %v704_v12  ;;  %1724 = vrot.lane.b32.xlu1 %v1631_v30, %s2990_s13 }
  0xd9   : > { %2681 = vmatprep.mubr.msk.bf16.mxu0 %vm928_vm4, %v866_v15  ;;  %1722 = vrot.lane.b32.xlu0 %v1630_v18, %s2990_s13 }
  0xda   : > { %2682 = vmatmul.mubr.msk.bf16.gmra.mrb[32].mxu0 %vm928_vm4, %v868_v60  ;;  %v646_v50 = vpop.permute.xlu1 %645  ;;  %v4366_v60 = vld [vmem:[#allocation8_spill] sm:$0xff] }
  0xdb   : > { %v644_v2 = vpop.permute.xlu0 %643  ;;  %v795_v58 = vsel %vm735_vm0, %v3347_v56, %v646_v50  ;;  %vm1378_vm15 = vcmp.gt.bf16.partialorder %v4366_v60, 0  ;;  %v4367_v50 = vld [vmem:[#allocation9_spill] sm:$0xff] }
  0xdc   : > { %1728 = vrot.lane.b32.xlu1 %v1633_v51, %s2990_s13  ;;  %v792_v33 = vsel %vm735_vm0, %v3353_v57, %v644_v2  ;;  %v1442_v51 = vsel %vm1378_vm15, 65537, %v4355_v52  ;;  %vm1379_vm1 = vcmp.gt.bf16.partialorder %v4367_v50, 0 }
  0xdd   : > { %1726 = vrot.lane.b32.xlu0 %v1632_v29, %s2990_s13  ;;  %v4368_v29 = vld [vmem:[#allocation27_spill] sm:$0xff] }
  0xde   : > { %v710_v28 = vpop.permute.xlu1 %709 }
  0xdf   : > { %v872_v32 = vsel %vm832_vm3, %v795_v58, %v710_v28  ;;  %v708_v1 = vpop.permute.xlu0 %707 }
  0xe0   : > { %v870_v17 = vsel %vm832_vm3, %v792_v33, %v708_v1  ;;  %v4369_v33 = vld [vmem:[#allocation26_spill] sm:$0xff] }
  0xe1   : > { %2685 = vmatprep.mubr.msk.bf16.mxu1 %vm928_vm4, %v870_v17  ;;  %v1506_v17 = vunpack.c.l.b16 %v1442_v51 }
  0xe2   : > { %2686 = vmatmul.mubr.msk.bf16.vlgmr.msra.gmra.mrb[0].mxu1 %vm928_vm4, %v872_v32  ;;  %v650_v0 = vpop.permute.xlu1 %649 }
  0xe3   : > { %v648_v21 = vpop.permute.xlu0 %647  ;;  %v801_v16 = vsel %vm735_vm0, %v4357_v37, %v650_v0  ;;  %vm1570_vm6 = vcmp.ne.s32.totalorder %v1506_v17, 0 }
  0xe4   : > { %v798_v57 = vsel %vm735_vm0, %v4356_v54, %v648_v21  ;;  %v1443_v21 = vsel %vm1379_vm1, 65537, %v4355_v52  ;;  %v4370_v54 = vld [vmem:[#allocation6_spill] sm:$0xff] }
  0xe5   : > { %vm1380_vm2 = vcmp.gt.bf16.partialorder %v4370_v54, 0 }
  0xe6   : > { %v714_v36 = vpop.permute.xlu1 %713 }
  0xe7   : > { %v876_v56 = vsel %vm832_vm3, %v801_v16, %v714_v36  ;;  %v712_v20 = vpop.permute.xlu0 %711  ;;  %v1507_v16 = vunpack.c.l.b16 %v1443_v21  ;;  %v2886_v21 = vld [vmem:[%s3104_s27 + $0xb0] sm:$0xf] }
  0xe8   : > { %v874_v5 = vsel %vm832_vm3, %v798_v57, %v712_v20  ;;  %v4371_v20 = vld [vmem:[#allocation7_spill] sm:$0xff] }
  0xe9   : > { %2689 = vmatprep.mubr.msk.bf16.mxu1 %vm928_vm4, %v874_v5 }
  0xea   : > { %2690 = vmatmul.mubr.msk.bf16.gmra.mrb[4].mxu1 %vm928_vm4, %v876_v56  ;;  %v654_v46 = vpop.permute.xlu1 %653  ;;  %v1444_v56 = vsel %vm1380_vm2, 65537, %v4355_v52 }
  0xeb   : > { %v652_v4 = vpop.permute.xlu0 %651  ;;  %v807_v25 = vsel %vm735_vm0, %v4359_v35, %v654_v46 }
  0xec   : > { %v804_v3 = vsel %vm735_vm0, %v4358_v49, %v652_v4  ;;  %v1634_v4 = vsel %vm1570_vm6, 1, %v4355_v52 }
  0xee   : > { %v718_v39 = vpop.permute.xlu1 %717 }
  0xef   : > { %v880_v53 = vsel %vm832_vm3, %v807_v25, %v718_v39  ;;  %v716_v34 = vpop.permute.xlu0 %715  ;;  %v4372_v25 = vld [vmem:[#allocation12_spill] sm:$0xff] }
  0xf0   : > { %v878_v38 = vsel %vm832_vm3, %v804_v3, %v716_v34  ;;  %v1508_v3 = vunpack.c.l.b16 %v1444_v56  ;;  %vm1382_vm9 = vcmp.gt.bf16.partialorder %v4372_v25, 0  ;;  %v2887_v56 = vld [vmem:[%s3104_s27 + $0xb4] sm:$0xf] }
  0xf1   : > { %2693 = vmatprep.mubr.msk.bf16.mxu1 %vm928_vm4, %v878_v38 }
  0xf2   : > { %2694 = vmatmul.mubr.msk.bf16.gmra.mrb[8].mxu1 %vm928_vm4, %v880_v53  ;;  %v658_v24 = vpop.permute.xlu1 %657  ;;  %vm1572_vm10 = vcmp.ne.s32.totalorder %v1508_v3, 0  ;;  %v2888_v3 = vld [vmem:[%s3104_s27 + $0xb8] sm:$0xf] }
  0xf3   : > { %v656_v6 = vpop.permute.xlu0 %655  ;;  %v813_v43 = vsel %vm735_vm0, %v4361_v11, %v658_v24  ;;  %v1636_v11 = vsel %vm1572_vm10, 1, %v4355_v52 }
  0xf4   : > { %v810_v59 = vsel %vm735_vm0, %v4360_v55, %v656_v6  ;;  %v1446_v6 = vsel %vm1382_vm9, 65537, %v4355_v52  ;;  %v4373_v55 = vld [vmem:[#allocation13_spill] sm:$0xff] }
  0xf5   : > { %vm1383_vm12 = vcmp.gt.bf16.partialorder %v4373_v55, 0 }
  0xf6   : > { %v722_v62 = vpop.permute.xlu1 %721 }
  0xf7   : > { %v884_v42 = vsel %vm832_vm3, %v813_v43, %v722_v62  ;;  %v720_v7 = vpop.permute.xlu0 %719  ;;  %v1510_v62 = vunpack.c.l.b16 %v1446_v6 }
  0xf8   : > { %v882_v23 = vsel %vm832_vm3, %v810_v59, %v720_v7  ;;  %v4374_v7 = vld [vmem:[#allocation10_spill] sm:$0xff] }
  0xf9   : > { %2697 = vmatprep.mubr.msk.bf16.mxu1 %vm928_vm4, %v882_v23  ;;  %vm1384_vm15 = vcmp.gt.bf16.partialorder %v4374_v7, 0  ;;  %vm1574_vm1 = vcmp.ne.s32.totalorder %v1510_v62, 0 }
  0xfa   : > { %2698 = vmatmul.mubr.msk.bf16.gmra.mrb[12].mxu1 %vm928_vm4, %v884_v42  ;;  %v662_v8 = vpop.permute.xlu1 %661  ;;  %v1447_v42 = vsel %vm1383_vm12, 65537, %v4355_v52 }
  0xfb   : > { %v660_v27 = vpop.permute.xlu0 %659  ;;  %v819_v26 = vsel %vm735_vm0, %v4363_v41, %v662_v8  ;;  %v4375_v41 = vld [vmem:[#allocation11_spill] sm:$0xff] }
  0xfc   : > { %v816_v22 = vsel %vm735_vm0, %v4362_v9, %v660_v27  ;;  %v1511_v9 = vunpack.c.l.b16 %v1447_v42 }
  0xfe   : > { %v726_v45 = vpop.permute.xlu1 %725  ;;  %vm1575_vm6 = vcmp.ne.s32.totalorder %v1511_v9, 0 }
  0xff   : > { %v888_v13 = vsel %vm832_vm3, %v819_v26, %v726_v45  ;;  %v724_v40 = vpop.permute.xlu0 %723  ;;  %v1638_v45 = vsel %vm1574_vm1, 1, %v4355_v52 }
 0x100   : > { %v886_v44 = vsel %vm832_vm3, %v816_v22, %v724_v40  ;;  %v1448_v22 = vsel %vm1384_vm15, 65537, %v4355_v52 }
 0x101   : > { %2701 = vmatprep.mubr.msk.bf16.mxu1 %vm928_vm4, %v886_v44  ;;  %v1512_v40 = vunpack.c.l.b16 %v1448_v22 }
 0x102   : > { %2702 = vmatmul.mubr.msk.bf16.gmra.mrb[16].mxu1 %vm928_vm4, %v888_v13  ;;  %v666_v63 = vpop.permute.xlu1 %665 }
 0x103   : > { %v664_v48 = vpop.permute.xlu0 %663  ;;  %v825_v47 = vsel %vm735_vm0, %v4365_v31, %v666_v63  ;;  %v4376_v63 = vld [vmem:[#allocation14_spill] sm:$0xff] }
 0x104   : > { %v822_v14 = vsel %vm735_vm0, %v4364_v61, %v664_v48  ;;  %v1639_v61 = vsel %vm1575_vm6, 1, %v4355_v52 }
 0x106   : > { %v730_v30 = vpop.permute.xlu1 %729 }
 0x107   : > { %v892_v19 = vsel %vm832_vm3, %v825_v47, %v730_v30  ;;  %v728_v10 = vpop.permute.xlu0 %727  ;;  %v4377_v30 = vld [vmem:[#allocation15_spill] sm:$0xff] }
 0x108   : > { %v890_v18 = vsel %vm832_vm3, %v822_v14, %v728_v10 }
 0x109   : > { %2705 = vmatprep.mubr.msk.bf16.mxu1 %vm928_vm4, %v890_v18 }
 0x10a   : > { %2706 = vmatmul.mubr.msk.bf16.gmra.mrb[20].mxu1 %vm928_vm4, %v892_v19  ;;  %v670_v12 = vpop.permute.xlu1 %669 }
 0x10b   : > { %v668_v15 = vpop.permute.xlu0 %667  ;;  %v831_v58 = vsel %vm735_vm0, %v4369_v33, %v670_v12 }
 0x10c   : > { %v828_v2 = vsel %vm735_vm0, %v4368_v29, %v668_v15  ;;  %v2884_v15 = vld [vmem:[%s3104_s27 + $0xa8] sm:$0xf] }
 0x10e   : > { %v734_v28 = vpop.permute.xlu1 %733 }
 0x10f   : > { %v896_v32 = vsel %vm832_vm3, %v831_v58, %v734_v28  ;;  %v732_v1 = vpop.permute.xlu0 %731  ;;  %v2885_v58 = vld [vmem:[%s3104_s27 + $0xac] sm:$0xf] }
 0x110   : > { %v894_v0 = vsel %vm832_vm3, %v828_v2, %v732_v1  ;;  %vm1381_vm3 = vcmp.gt.bf16.partialorder %v4371_v20, 0 }
 0x111   : > { %2709 = vmatprep.mubr.msk.bf16.mxu1 %vm928_vm4, %v894_v0  ;;  %v1445_v35 = vsel %vm1381_vm3, 65537, %v4355_v52  ;;  %vm1386_vm3 = vcmp.gt.bf16.partialorder %v4376_v63, 0 }
 0x112   : > { %2710 = vmatmul.mubr.msk.bf16.gmra.mrb[24].mxu1 %vm928_vm4, %v896_v32  ;;  %v1669_v57 = vpop.permute.xlu1 %1668  ;;  %vm1571_vm4 = vcmp.ne.s32.totalorder %v1507_v16, 0  ;;  %v1509_v24 = vunpack.c.l.b16 %v1445_v35  ;;  %v1450_v47 = vsel %vm1386_vm3, 65537, %v4355_v52 }
 0x113   : > { %vm1795_vm5 = vcmp.ne.s32.totalorder %v1669_v57, 0  ;;  %v1667_v37 = vpop.permute.xlu0 %1666  ;;  %v1635_v53 = vsel %vm1571_vm4, 1, %v4355_v52  ;;  %vm1576_vm4 = vcmp.ne.s32.totalorder %v1512_v40, 0  ;;  %v1514_v60 = vunpack.c.l.b16 %v1450_v47 }
 0x114   : > { %vm1794_vm0 = vcmp.ne.s32.totalorder %v1667_v37, 0  ;;  %v1859_v36 = vsel %vm1795_vm5, 1, %v4355_v52  ;;  %vm1573_vm13 = vcmp.ne.s32.totalorder %v1509_v24, 0  ;;  %vm1385_vm5 = vcmp.gt.bf16.partialorder %v4375_v41, 0 }
 0x115   : > { %1926 = vperm.xlu1 %2844, %v1859_v36   ;;  %v1858_v5 = vsel %vm1794_vm0, 1, %v4355_v52  ;;  %v1637_v8 = vsel %vm1573_vm13, 1, %v4355_v52  ;;  %v1449_v44 = vsel %vm1385_vm5, 65537, %v4355_v52  ;;  %v1640_v10 = vsel %vm1576_vm4, 1, %v4355_v52 }
 0x116   : > { %1923 = vperm.xlu0 %2843, %v1858_v5   ;;  %v1673_v46 = vpop.permute.xlu1 %1672  ;;  %v1513_v31 = vunpack.c.l.b16 %v1449_v44  ;;  %vm1578_vm12 = vcmp.ne.s32.totalorder %v1514_v60, 0 }
 0x117   : > { %v1671_v49 = vpop.permute.xlu0 %1670  ;;  %vm1797_vm8 = vcmp.ne.s32.totalorder %v1673_v46, 0  ;;  %v1642_v32 = vsel %vm1578_vm12, 1, %v4355_v52 }
 0x118   : > { %vm1796_vm7 = vcmp.ne.s32.totalorder %v1671_v49, 0  ;;  %v1861_v34 = vsel %vm1797_vm8, 1, %v4355_v52  ;;  %vm1387_vm8 = vcmp.gt.bf16.partialorder %v4377_v30, 0  ;;  %vm1577_vm9 = vcmp.ne.s32.totalorder %v1513_v31, 0 }
 0x119   : > { %v1860_v39 = vsel %vm1796_vm7, 1, %v4355_v52  ;;  %1730 = vrot.lane.b32.xlu1 %v1634_v4, %s2990_s13  ;;  %v1451_v12 = vsel %vm1387_vm8, 65537, %v4355_v52  ;;  %v1641_v50 = vsel %vm1577_vm9, 1, %v4355_v52 }
 0x11a   : > { %1929 = vperm.xlu0 %2843, %v1860_v39   ;;  %v1677_v59 = vpop.permute.xlu1 %1676  ;;  %v1515_v2 = vunpack.c.l.b16 %v1451_v12 }
 0x11b   : > { %v1675_v38 = vpop.permute.xlu0 %1674  ;;  %vm1799_vm14 = vcmp.ne.s32.totalorder %v1677_v59, 0 }
 0x11c   : > { %vm1798_vm11 = vcmp.ne.s32.totalorder %v1675_v38, 0  ;;  %v1863_v27 = vsel %vm1799_vm14, 1, %v4355_v52  ;;  %vm1389_vm14 = vcmp.gt.bf16.partialorder %v2885_v58, 0  ;;  %vm1579_vm15 = vcmp.ne.s32.totalorder %v1515_v2, 0  ;;  %v2889_v38 = vld [vmem:[%s3104_s27 + $0xbc] sm:$0xf] }
 0x11d   : > { %1732 = vrot.lane.b32.xlu1 %v1635_v53, %s2990_s13  ;;  %v1862_v43 = vsel %vm1798_vm11, 1, %v4355_v52  ;;  %vm1388_vm11 = vcmp.gt.bf16.partialorder %v2884_v15, 0  ;;  %v1453_v0 = vsel %vm1389_vm14, 65537, %v4355_v52  ;;  %v1643_v57 = vsel %vm1579_vm15, 1, %v4355_v52 }
 0x11e   : > { %1932 = vperm.xlu0 %2843, %v1861_v34   ;;  %v1681_v26 = vpop.permute.xlu1 %1680  ;;  %v1452_v33 = vsel %vm1388_vm11, 65537, %v4355_v52  ;;  %v1517_v16 = vunpack.c.l.b16 %v1453_v0 }
 0x11f   : > { %v1679_v23 = vpop.permute.xlu0 %1678  ;;  %vm1801_vm0 = vcmp.ne.s32.totalorder %v1681_v26, 0  ;;  %v1516_v17 = vunpack.c.l.b16 %v1452_v33 }
 0x120   : > { %vm1800_vm2 = vcmp.ne.s32.totalorder %v1679_v23, 0  ;;  %v1865_v14 = vsel %vm1801_vm0, 1, %v4355_v52  ;;  %vm1391_vm0 = vcmp.gt.bf16.partialorder %v2887_v56, 0  ;;  %vm1581_vm3 = vcmp.ne.s32.totalorder %v1517_v16, 0 }
 0x121   : > { %1734 = vrot.lane.b32.xlu1 %v1636_v11, %s2990_s13  ;;  %v1864_v13 = vsel %vm1800_vm2, 1, %v4355_v52  ;;  %vm1390_vm2 = vcmp.gt.bf16.partialorder %v2886_v21, 0  ;;  %vm1580_vm5 = vcmp.ne.s32.totalorder %v1516_v17, 0  ;;  %v1455_v49 = vsel %vm1391_vm0, 65537, %v4355_v52 }
 0x122   : > { %1935 = vperm.xlu0 %2843, %v1862_v43   ;;  %v1685_v19 = vpop.permute.xlu1 %1684  ;;  %v1454_v36 = vsel %vm1390_vm2, 65537, %v4355_v52  ;;  %v1644_v5 = vsel %vm1580_vm5, 1, %v4355_v52  ;;  %v1645_v25 = vsel %vm1581_vm3, 1, %v4355_v52  ;;  %v1519_v53 = vunpack.c.l.b16 %v1455_v49  ;;  %v2890_v43 = vld [vmem:[%s3104_s27 + $0xc0] sm:$0xf] }
 0x123   : > { %v1683_v48 = vpop.permute.xlu0 %1682  ;;  %vm1803_vm10 = vcmp.ne.s32.totalorder %v1685_v19, 0  ;;  %v1518_v4 = vunpack.c.l.b16 %v1454_v36 }
 0x124   : > { %vm1802_vm7 = vcmp.ne.s32.totalorder %v1683_v48, 0  ;;  %v1867_v29 = vsel %vm1803_vm10, 1, %v4355_v52  ;;  %vm1393_vm10 = vcmp.gt.bf16.partialorder %v2889_v38, 0  ;;  %vm1583_vm11 = vcmp.ne.s32.totalorder %v1519_v53, 0 }
 0x125   : > { %1736 = vrot.lane.b32.xlu1 %v1637_v8, %s2990_s13  ;;  %v1866_v18 = vsel %vm1802_vm7, 1, %v4355_v52  ;;  %vm1392_vm7 = vcmp.gt.bf16.partialorder %v2888_v3, 0  ;;  %vm1582_vm8 = vcmp.ne.s32.totalorder %v1518_v4, 0  ;;  %v1457_v11 = vsel %vm1393_vm10, 65537, %v4355_v52 }
 0x126   : > { %1938 = vperm.xlu0 %2843, %v1863_v27   ;;  %v1689_v28 = vpop.permute.xlu1 %1688  ;;  %v1456_v34 = vsel %vm1392_vm7, 65537, %v4355_v52  ;;  %v1646_v6 = vsel %vm1582_vm8, 1, %v4355_v52  ;;  %v1647_v42 = vsel %vm1583_vm11, 1, %v4355_v52  ;;  %v1521_v23 = vunpack.c.l.b16 %v1457_v11  ;;  %v2891_v27 = vld [vmem:[%s3104_s27 + $0xc4] sm:$0xf] }
 0x127   : > { %v1687_v51 = vpop.permute.xlu0 %1686  ;;  %vm1805_vm1 = vcmp.ne.s32.totalorder %v1689_v28, 0  ;;  %v1520_v59 = vunpack.c.l.b16 %v1456_v34 }
 0x128   : > { %vm1804_vm13 = vcmp.ne.s32.totalorder %v1687_v51, 0  ;;  %v1869_v37 = vsel %vm1805_vm1, 1, %v4355_v52  ;;  %vm1395_vm1 = vcmp.gt.bf16.partialorder %v2891_v27, 0  ;;  %vm1585_vm2 = vcmp.ne.s32.totalorder %v1521_v23, 0 }
 0x129   : > { %1738 = vrot.lane.b32.xlu1 %v1638_v45, %s2990_s13  ;;  %v1868_v1 = vsel %vm1804_vm13, 1, %v4355_v52  ;;  %vm1394_vm13 = vcmp.gt.bf16.partialorder %v2890_v43, 0  ;;  %vm1584_vm14 = vcmp.ne.s32.totalorder %v1520_v59, 0  ;;  %v1459_v45 = vsel %vm1395_vm1, 65537, %v4355_v52 }
 0x12a   : > { %1941 = vperm.xlu0 %2843, %v1864_v13   ;;  %v1693_v20 = vpop.permute.xlu1 %1692  ;;  %v1458_v8 = vsel %vm1394_vm13, 65537, %v4355_v52  ;;  %v1648_v22 = vsel %vm1584_vm14, 1, %v4355_v52  ;;  %v2892_v13 = vld [vmem:[%s3104_s27 + $0xc8] sm:$0xf]  ;;  %v1649_v44 = vsel %vm1585_vm2, 1, %v4355_v52  ;;  %v1523_v48 = vunpack.c.l.b16 %v1459_v45 }
 0x12b   : > { %v1691_v54 = vpop.permute.xlu0 %1690  ;;  %vm1807_vm4 = vcmp.ne.s32.totalorder %v1693_v20, 0  ;;  %v1522_v26 = vunpack.c.l.b16 %v1458_v8 }
 0x12c   : > { %vm1806_vm6 = vcmp.ne.s32.totalorder %v1691_v54, 0  ;;  %v1871_v39 = vsel %vm1807_vm4, 1, %v4355_v52  ;;  %vm1587_vm7 = vcmp.ne.s32.totalorder %v1523_v48, 0 }
 0x12d   : > { %1740 = vrot.lane.b32.xlu1 %v1639_v61, %s2990_s13  ;;  %v1870_v46 = vsel %vm1806_vm6, 1, %v4355_v52  ;;  %vm1396_vm6 = vcmp.gt.bf16.partialorder %v2892_v13, 0  ;;  %vm1586_vm0 = vcmp.ne.s32.totalorder %v1522_v26, 0  ;;  %v1651_v12 = vsel %vm1587_vm7, 1, %v4355_v52 }
 0x12e   : > { %1944 = vperm.xlu0 %2843, %v1865_v14   ;;  %v1697_v24 = vpop.permute.xlu1 %1696  ;;  %v1460_v61 = vsel %vm1396_vm6, 65537, %v4355_v52  ;;  %v2893_v14 = vld [vmem:[%s3104_s27 + $0xcc] sm:$0xf]  ;;  %v1650_v47 = vsel %vm1586_vm0, 1, %v4355_v52 }
 0x12f   : > { %v1695_v35 = vpop.permute.xlu0 %1694  ;;  %vm1809_vm12 = vcmp.ne.s32.totalorder %v1697_v24, 0  ;;  %vm1397_vm4 = vcmp.gt.bf16.partialorder %v2893_v14, 0  ;;  %v1524_v19 = vunpack.c.l.b16 %v1460_v61  ;;  %v2902_v61 = vld [vmem:[%s3104_s27 + $0xf0] sm:$0xf] }
 0x130   : > { %vm1808_vm9 = vcmp.ne.s32.totalorder %v1695_v35, 0  ;;  %v1873_v7 = vsel %vm1809_vm12, 1, %v4355_v52 }
 0x131   : > { %1742 = vrot.lane.b32.xlu1 %v1640_v10, %s2990_s13  ;;  %v1872_v55 = vsel %vm1808_vm9, 1, %v4355_v52  ;;  %v1461_v10 = vsel %vm1397_vm4, 65537, %v4355_v52  ;;  %vm1588_vm10 = vcmp.ne.s32.totalorder %v1524_v19, 0 }
 0x132   : > { %1947 = vperm.xlu0 %2843, %v1866_v18   ;;  %v1701_v9 = vpop.permute.xlu1 %1700  ;;  %v2894_v18 = vld [vmem:[%s3104_s27 + $0xd0] sm:$0xf]  ;;  %v1525_v51 = vunpack.c.l.b16 %v1461_v10  ;;  %v1652_v33 = vsel %vm1588_vm10, 1, %v4355_v52  ;;  %v2903_v10 = vld [vmem:[%s3104_s27 + $0xf4] sm:$0xf] }
 0x133   : > { %v1699_v62 = vpop.permute.xlu0 %1698  ;;  %vm1811_vm5 = vcmp.ne.s32.totalorder %v1701_v9, 0  ;;  %vm1398_vm9 = vcmp.gt.bf16.partialorder %v2894_v18, 0  ;;  %v2901_v9 = vld [vmem:[%s3104_s27 + $0xec] sm:$0xf] }
 0x134   : > { %vm1810_vm15 = vcmp.ne.s32.totalorder %v1699_v62, 0  ;;  %v1875_v63 = vsel %vm1811_vm5, 1, %v4355_v52  ;;  %vm1589_vm13 = vcmp.ne.s32.totalorder %v1525_v51, 0  ;;  %v2900_v62 = vld [vmem:[%s3104_s27 + $0xe8] sm:$0xf] }
 0x135   : > { %1744 = vrot.lane.b32.xlu1 %v1641_v50, %s2990_s13  ;;  %v1874_v41 = vsel %vm1810_vm15, 1, %v4355_v52  ;;  %v1462_v50 = vsel %vm1398_vm9, 65537, %v4355_v52  ;;  %v1653_v0 = vsel %vm1589_vm13, 1, %v4355_v52 }
 0x136   : > { %1950 = vperm.xlu0 %2843, %v1867_v29   ;;  %v1705_v31 = vpop.permute.xlu1 %1704  ;;  %v2895_v29 = vld [vmem:[%s3104_s27 + $0xd4] sm:$0xf]  ;;  %v1526_v28 = vunpack.c.l.b16 %v1462_v50 }
 0x137   : > { %v1703_v40 = vpop.permute.xlu0 %1702  ;;  %vm1813_vm8 = vcmp.ne.s32.totalorder %v1705_v31, 0  ;;  %vm1399_vm12 = vcmp.gt.bf16.partialorder %v2895_v29, 0 }
 0x138   : > { %vm1812_vm3 = vcmp.ne.s32.totalorder %v1703_v40, 0  ;;  %v1877_v15 = vsel %vm1813_vm8, 1, %v4355_v52  ;;  %vm1590_vm1 = vcmp.ne.s32.totalorder %v1526_v28, 0 }
 0x139   : > { %1746 = vrot.lane.b32.xlu1 %v1642_v32, %s2990_s13  ;;  %v1876_v30 = vsel %vm1812_vm3, 1, %v4355_v52  ;;  %v1463_v32 = vsel %vm1399_vm12, 65537, %v4355_v52  ;;  %v1654_v36 = vsel %vm1590_vm1, 1, %v4355_v52 }
 0x13a   : > { %1953 = vperm.xlu0 %2843, %v1868_v1   ;;  %v1709_v2 = vpop.permute.xlu1 %1708  ;;  %v2896_v1 = vld [vmem:[%s3104_s27 + $0xd8] sm:$0xf]  ;;  %v1527_v54 = vunpack.c.l.b16 %v1463_v32 }
 0x13b   : > { %v1707_v60 = vpop.permute.xlu0 %1706  ;;  %vm1815_vm14 = vcmp.ne.s32.totalorder %v1709_v2, 0  ;;  %vm1400_vm15 = vcmp.gt.bf16.partialorder %v2896_v1, 0 }
 0x13c   : > { %vm1814_vm11 = vcmp.ne.s32.totalorder %v1707_v60, 0  ;;  %v1879_v21 = vsel %vm1815_vm14, 1, %v4355_v52  ;;  %vm1591_vm6 = vcmp.ne.s32.totalorder %v1527_v54, 0  ;;  %vm1405_vm14 = vcmp.gt.bf16.partialorder %v2901_v9, 0 }
 0x13d   : > { %1748 = vrot.lane.b32.xlu1 %v1643_v57, %s2990_s13  ;;  %v1878_v58 = vsel %vm1814_vm11, 1, %v4355_v52  ;;  %v1464_v57 = vsel %vm1400_vm15, 65537, %v4355_v52  ;;  %v1655_v49 = vsel %vm1591_vm6, 1, %v4355_v52  ;;  %vm1404_vm11 = vcmp.gt.bf16.partialorder %v2900_v62, 0 }
 0x13e   : > { %1956 = vperm.xlu0 %2843, %v1869_v37   ;;  %v2897_v37 = vld [vmem:[%s3104_s27 + $0xdc] sm:$0xf]  ;;  %v1713_v16 = vpop.permute.xlu1 %1712  ;;  %v1528_v20 = vunpack.c.l.b16 %v1464_v57  ;;  %v1468_v27 = vsel %vm1404_vm11, 65537, %v4355_v52  ;;  %v1469_v48 = vsel %vm1405_vm14, 65537, %v4355_v52 }
 0x13f   : > { %v1711_v17 = vpop.permute.xlu0 %1710  ;;  %vm1401_vm5 = vcmp.gt.bf16.partialorder %v2897_v37, 0  ;;  %vm1817_vm0 = vcmp.ne.s32.totalorder %v1713_v16, 0 }
 0x140   : > { %vm1816_vm2 = vcmp.ne.s32.totalorder %v1711_v17, 0  ;;  %v1881_v3 = vsel %vm1817_vm0, 1, %v4355_v52  ;;  %vm1592_vm4 = vcmp.ne.s32.totalorder %v1528_v20, 0  ;;  %vm1407_vm0 = vcmp.gt.bf16.partialorder %v2903_v10, 0 }
 0x141   : > { %1750 = vrot.lane.b32.xlu1 %v1644_v5, %s2990_s13  ;;  %v1880_v56 = vsel %vm1816_vm2, 1, %v4355_v52  ;;  %v1465_v5 = vsel %vm1401_vm5, 65537, %v4355_v52  ;;  %v1656_v24 = vsel %vm1592_vm4, 1, %v4355_v52  ;;  %vm1406_vm2 = vcmp.gt.bf16.partialorder %v2902_v61, 0 }
 0x142   : > { %1959 = vperm.xlu0 %2843, %v1870_v46   ;;  %v2898_v46 = vld [vmem:[%s3104_s27 + $0xe0] sm:$0xf]  ;;  %v1529_v35 = vunpack.c.l.b16 %v1465_v5  ;;  %v1717_v34 = vpop.permute.xlu1 %1716  ;;  %v1470_v19 = vsel %vm1406_vm2, 65537, %v4355_v52 }
 0x143   : > { %vm1402_vm3 = vcmp.gt.bf16.partialorder %v2898_v46, 0  ;;  %v1715_v4 = vpop.permute.xlu0 %1714  ;;  %vm1819_vm10 = vcmp.ne.s32.totalorder %v1717_v34, 0  ;;  %v1534_v29 = vunpack.c.l.b16 %v1470_v19 }
 0x144   : > { %vm1818_vm7 = vcmp.ne.s32.totalorder %v1715_v4, 0  ;;  %vm1593_vm9 = vcmp.ne.s32.totalorder %v1529_v35, 0  ;;  %v1883_v23 = vsel %vm1819_vm10, 1, %v4355_v52 }
 0x145   : > { %1752 = vrot.lane.b32.xlu1 %v1645_v25, %s2990_s13  ;;  %v1466_v25 = vsel %vm1402_vm3, 65537, %v4355_v52 }
 0x146   : > { %1962 = vperm.xlu0 %2843, %v1871_v39   ;;  %v2899_v39 = vld [vmem:[%s3104_s27 + $0xe4] sm:$0xf]  ;;  %v1530_v59 = vunpack.c.l.b16 %v1466_v25  ;;  %v3924_v25 = vld [vmem:[%s4303_s3] ss:$0 sm:$0xff] }
 0x147   : > { %vm1403_vm8 = vcmp.gt.bf16.partialorder %v2899_v39, 0 }
 0x148   : > { %v1467_v43 = vsel %vm1403_vm8, 65537, %v4355_v52  ;;  %vm1594_vm12 = vcmp.ne.s32.totalorder %v1530_v59, 0  ;;  %vm1598_vm8 = vcmp.ne.s32.totalorder %v1534_v29, 0 }
 0x149   : > { %1754 = vrot.lane.b32.xlu1 %v1646_v6, %s2990_s13  ;;  %v1882_v6 = vsel %vm1818_vm7, 1, %v4355_v52  ;;  %v1531_v8 = vunpack.c.l.b16 %v1467_v43  ;;  %v1658_v45 = vsel %vm1594_vm12, 1, %v4355_v52  ;;  %v1662_v37 = vsel %vm1598_vm8, 1, %v4355_v52 }
 0x14a   : > { %1965 = vperm.xlu0 %2843, %v1872_v55  }
 0x14b   : > { %vm1595_vm15 = vcmp.ne.s32.totalorder %v1531_v8, 0 }
 0x14c   : > { %v1659_v31 = vsel %vm1595_vm15, 1, %v4355_v52 }
 0x14d   : > { %1756 = vrot.lane.b32.xlu1 %v1647_v42, %s2990_s13  ;;  %v1719_v42 = vpop.permute.xlu0 %1718 }
 0x14e   : > { %1968 = vperm.xlu0 %2843, %v1873_v7   ;;  %v1657_v7 = vsel %vm1593_vm9, 1, %v4355_v52  ;;  %vm1820_vm13 = vcmp.ne.s32.totalorder %v1719_v42, 0 }
 0x14f   : > { %v1884_v13 = vsel %vm1820_vm13, 1, %v4355_v52 }
 0x151   : > { %1758 = vrot.lane.b32.xlu1 %v1648_v22, %s2990_s13  ;;  %v1723_v14 = vpop.permute.xlu0 %1722 }
 0x152   : > { %1971 = vperm.xlu0 %2843, %v1874_v41   ;;  %v1721_v41 = vpop.permute.xlu1 %1720  ;;  %vm1822_vm6 = vcmp.ne.s32.totalorder %v1723_v14, 0 }
 0x153   : > { %vm1821_vm1 = vcmp.ne.s32.totalorder %v1721_v41, 0 }
 0x155   : > { %1760 = vrot.lane.b32.xlu1 %v1649_v44, %s2990_s13  ;;  %v1532_v44 = vunpack.c.l.b16 %v1468_v27  ;;  %v1727_v28 = vpop.permute.xlu0 %1726 }
 0x156   : > { %1974 = vperm.xlu0 %2843, %v1875_v63   ;;  %v1725_v50 = vpop.permute.xlu1 %1724  ;;  %vm1824_vm9 = vcmp.ne.s32.totalorder %v1727_v28, 0 }
 0x157   : > { %vm1596_vm5 = vcmp.ne.s32.totalorder %v1532_v44, 0  ;;  %vm1823_vm7 = vcmp.ne.s32.totalorder %v1725_v50, 0 }
 0x159   : > { %1762 = vrot.lane.b32.xlu1 %v1650_v47, %s2990_s13  ;;  %v1885_v47 = vsel %vm1821_vm1, 1, %v4355_v52 }
 0x15a   : > { %1977 = vperm.xlu0 %2843, %v1876_v30   ;;  %v1533_v30 = vunpack.c.l.b16 %v1469_v48  ;;  %v1729_v16 = vpop.permute.xlu1 %1728 }
 0x15b   : > { %vm1825_vm12 = vcmp.ne.s32.totalorder %v1729_v16, 0 }
 0x15c   : > { %vm1597_vm3 = vcmp.ne.s32.totalorder %v1533_v30, 0 }
 0x15d   : > { %1764 = vrot.lane.b32.xlu1 %v1651_v12, %s2990_s13  ;;  %v1660_v12 = vsel %vm1596_vm5, 1, %v4355_v52  ;;  %v1661_v32 = vsel %vm1597_vm3, 1, %v4355_v52 }
 0x15e   : > { %1980 = vperm.xlu0 %2843, %v1877_v15   ;;  %v1886_v15 = vsel %vm1822_vm6, 1, %v4355_v52 }
 0x161   : > { %1766 = vrot.lane.b32.xlu1 %v1652_v33, %s2990_s13  ;;  %v1471_v33 = vsel %vm1407_vm0, 65537, %v4355_v52 }
 0x162   : > { %1983 = vperm.xlu0 %2843, %v1878_v58   ;;  %v2904_v58 = vld [vmem:[%s3104_s27 + $0xf8] sm:$0xf]  ;;  %v1535_v1 = vunpack.c.l.b16 %v1471_v33 }
 0x163   : > { %vm1408_vm4 = vcmp.gt.bf16.partialorder %v2904_v58, 0 }
 0x164   : > { %v1472_v17 = vsel %vm1408_vm4, 65537, %v4355_v52  ;;  %vm1599_vm11 = vcmp.ne.s32.totalorder %v1535_v1, 0 }
 0x165   : > { %1768 = vrot.lane.b32.xlu1 %v1653_v0, %s2990_s13  ;;  %v2905_v0 = vld [vmem:[%s3104_s27 + $0xfc] sm:$0xf]  ;;  %v1536_v20 = vunpack.c.l.b16 %v1472_v17  ;;  %v1663_v4 = vsel %vm1599_vm11, 1, %v4355_v52  ;;  %s2913_s27 = scalar_lea.vmem %s2912_s20, 32 }
 0x166   : > { %1986 = vperm.xlu0 %2843, %v1879_v21   ;;  %vm1409_vm10 = vcmp.gt.bf16.partialorder %v2905_v0, 0  ;;  %v1887_v21 = vsel %vm1823_vm7, 1, %v4355_v52 }
 0x167   : > { %v1473_v46 = vsel %vm1409_vm10, 65537, %v4355_v52  ;;  %vm1600_vm13 = vcmp.ne.s32.totalorder %v1536_v20, 0 }
 0x168   : > { %v1664_v34 = vsel %vm1600_vm13, 1, %v4355_v52 }
 0x169   : > { %1770 = vrot.lane.b32.xlu1 %v1654_v36, %s2990_s13  ;;  %v1888_v36 = vsel %vm1824_vm9, 1, %v4355_v52 }
 0x16a   : > { %1989 = vperm.xlu0 %2843, %v1880_v56  }
 0x16d   : > { %v3849_v53 = vpop.f32.mrb[0].mxu0  ;;  %1772 = vrot.lane.b32.xlu1 %v1655_v49, %s2990_s13  ;;  %v1537_v49 = vunpack.c.l.b16 %v1473_v46 }
 0x16e   : > { %1992 = vperm.xlu0 %2843, %v1881_v3   ;;  %v3852_v38 = vpop.f32.mrb[1].mxu0  ;;  %v1889_v3 = vsel %vm1825_vm12, 1, %v4355_v52 }
 0x16f   : > { %v3856_v55 = vpop.f32.mrb[2].mxu0  ;;  %vm1601_vm14 = vcmp.ne.s32.totalorder %v1537_v49, 0  ;;  %v1028_v43 = vadd.f32 %v3924_v25, %v3852_v38 }
 0x170   : > { %v3858_v11 = vpop.f32.mrb[3].mxu0  ;;  %v1665_v62 = vsel %vm1601_vm14, 1, %v4355_v52 }
 0x171   : > { %1774 = vrot.lane.b32.xlu1 %v1656_v24, %s2990_s13  ;;  %v1282_v8 = vmax.f32 %v1028_v43, 0.0 }
 0x172   : > { %1995 = vperm.xlu0 %2843, %v1882_v6   ;;  %v1031_v6 = vadd.f32 %v3924_v25, %v3858_v11 }
 0x174   : > { %v1283_v42 = vmax.f32 %v1031_v6, 0.0 }
 0x175   : > { %v3867_v22 = vpop.f32.mrb[4].mxu0  ;;  %1776 = vrot.lane.b32.xlu1 %v1657_v7, %s2990_s13 }
 0x176   : > { %1998 = vperm.xlu0 %2843, %v1883_v23   ;;  %v3870_v26 = vpop.f32.mrb[5].mxu0  ;;  %v1036_v23 = vadd.f32 %v3849_v53, %v3924_v25  ;;  %v1039_v53 = vadd.f32 %v3856_v55, %v3924_v25  ;;  %v1052_v20 = vadd.f32 %v3867_v22, %v3924_v25 }
 0x177   : > { %v3874_v40 = vpop.f32.mrb[6].mxu0 }
 0x178   : > { %v3876_v63 = vpop.f32.mrb[7].mxu0  ;;  %v1284_v61 = vmax.f32 %v1036_v23, 0.0  ;;  %v1285_v10 = vmax.f32 %v1039_v53, 0.0  ;;  %v1055_v22 = vadd.f32 %v3874_v40, %v3924_v25 }
 0x179   : > { %1778 = vrot.lane.b32.xlu1 %v1658_v45, %s2990_s13 }
 0x17a   : > { %2001 = vperm.xlu0 %2843, %v1884_v13  }
 0x17d   : > { %v3885_v18 = vpop.f32.mrb[8].mxu0  ;;  %1780 = vrot.lane.b32.xlu1 %v1659_v31, %s2990_s13 }
 0x17e   : > { %2004 = vperm.xlu0 %2843, %v1885_v47   ;;  %v3888_v60 = vpop.f32.mrb[9].mxu0 }
 0x17f   : > { %v3892_v51 = vpop.f32.mrb[10].mxu0 }
 0x180   : > { %v3894_v2 = vpop.f32.mrb[11].mxu0 }
 0x181   : > { %1782 = vrot.lane.b32.xlu1 %v1660_v12, %s2990_s13  ;;  %v1044_v12 = vadd.f32 %v3924_v25, %v3870_v26  ;;  %v1047_v26 = vadd.f32 %v3924_v25, %v3876_v63 }
 0x182   : > { %2007 = vperm.xlu0 %2843, %v1886_v15  }
 0x183   : > { %v1286_v17 = vmax.f32 %v1044_v12, 0.0  ;;  %v1287_v46 = vmax.f32 %v1047_v26, 0.0 }
 0x185   : > { %v3903_v54 = vpop.f32.mrb[12].mxu0  ;;  %1784 = vrot.lane.b32.xlu1 %v1661_v32, %s2990_s13 }
 0x186   : > { %2010 = vperm.xlu0 %2843, %v1887_v21   ;;  %v3906_v57 = vpop.f32.mrb[13].mxu0 }
 0x187   : > { %v3910_v56 = vpop.f32.mrb[14].mxu0 }
 0x188   : > { %v3912_v5 = vpop.f32.mrb[15].mxu0 }
 0x189   : > { %1786 = vrot.lane.b32.xlu1 %v1662_v37, %s2990_s13 }
 0x18a   : > { %2013 = vperm.xlu0 %2843, %v1888_v36  }
 0x18d   : > { %v3918_v35 = vpop.f32.mrb[16].mxu0  ;;  %1788 = vrot.lane.b32.xlu1 %v1663_v4, %s2990_s13 }
 0x18e   : > { %2016 = vperm.xlu0 %2843, %v1889_v3   ;;  %v3926_v39 = vpop.f32.mrb[17].mxu0 }
 0x18f   : > { %v3929_v24 = vpop.f32.mrb[18].mxu0 }
 0x190   : > { %v3933_v59 = vpop.f32.mrb[19].mxu0 }
 0x191   : > { %1790 = vrot.lane.b32.xlu1 %v1664_v34, %s2990_s13 }
 0x194   : > { %v1927_v7 = vpop.permute.xlu1 %1926 }
 0x195   : > { %vm2115_vm15 = vcmp.eq.s32.totalorder %v1927_v7, 1  ;;  %v1924_v27 = vpop.permute.xlu0 %1923  ;;  %v3941_v9 = vpop.f32.mrb[20].mxu0  ;;  %1792 = vrot.lane.b32.xlu1 %v1665_v62, %s2990_s13  ;;  %v1288_v7 = vmax.f32 %v1052_v20, 0.0  ;;  %s2420_s13 = sshll.u32 %s314_s14, 4  ;;  %s4255_s13 = int_to_ptr.vmem [resolvable:$true] %s2420_s13 }
 0x196   : > { %v2179_v11 = vsel %vm2115_vm15, %v1283_v42, 0.0  ;;  %vm2114_vm1 = vcmp.eq.s32.totalorder %v1924_v27, 1  ;;  %v3944_v41 = vpop.f32.mrb[21].mxu0  ;;  %s2907_s19 = scalar_lea.vmem %s4255_s13, 16  ;;  %p2914_p1 = scmp.lt.s32.totalorder %s4255_s13, %s2912_s20 }
 0x197   : > { %v2178_v38 = vsel %vm2114_vm1, %v1282_v8, 0.0  ;;  %v3946_v45 = vpop.f32.mrb[22].mxu0  ;;  %p2908_p12 = scmp.ne.s32.totalorder %s4255_s13, %s2907_s19  ;;  %p2915_p2 = scmp.lt.s32.totalorder %s2913_s27, %s2907_s19 }
 0x198   : > { %v2243_v13 = vadd.f32 %v2179_v11, %v2178_v38  ;;  %v3948_v44 = vpop.f32.mrb[23].mxu0  ;;  %v1731_v48 = vpop.permute.xlu1 %1730 }
 0x199   : > { %vm1826_vm2 = vcmp.ne.s32.totalorder %v1731_v48, 0  ;;  %v1930_v14 = vpop.permute.xlu0 %1929  ;;  %v1060_v48 = vadd.f32 %v3924_v25, %v3888_v60  ;;  %v1063_v60 = vadd.f32 %v3924_v25, %v3894_v2  ;;  %p2909_p13 = pnand %p2908_p12, %p3070_p4  ;;  %p2916_p3 = por %p2915_p2, %p2914_p1 }
 0x19a   : > { %v1890_v31 = vsel %vm1826_vm2, 1, %v4355_v52  ;;  %vm2116_vm5 = vcmp.eq.s32.totalorder %v1930_v14, 1 }
 0x19b   : > { %v2180_v47 = vsel %vm2116_vm5, %v1284_v61, 0.0  ;;  %2019 = vperm.xlu0 %2843, %v1890_v31   ;;  %v1290_v12 = vmax.f32 %v1060_v48, 0.0  ;;  %v1291_v26 = vmax.f32 %v1063_v60, 0.0  ;;  %p2910_p0 = pneg %p2909_p13 }
 0x19c   : > { %v2244_v30 = vadd.f32 %v2243_v13, %v2180_v47  ;;  %v1733_v19 = vpop.permute.xlu1 %1732  ;;  %v1289_v13 = vmax.f32 %v1055_v22, 0.0 }
 0x19d   : > { %vm1827_vm6 = vcmp.ne.s32.totalorder %v1733_v19, 0  ;;  %v1933_v15 = vpop.permute.xlu0 %1932  ;;  %v3955_v50 = vpop.f32.mrb[24].mxu0  ;;  %p2917_p5 = pnand %p2916_p3, %p2910_p0 }
 0x19e   : > { %v1891_v29 = vsel %vm1827_vm6, 1, %v4355_v52  ;;  %vm2117_vm0 = vcmp.eq.s32.totalorder %v1933_v15, 1  ;;  %v3958_v55 = vpop.f32.mrb[25].mxu0 }
 0x19f   : > { %v2181_v33 = vsel %vm2117_vm0, %v1285_v10, 0.0  ;;  %v3960_v58 = vpop.f32.mrb[26].mxu0  ;;  %2022 = vperm.xlu0 %2843, %v1891_v29  }
 0x1a0   : > { %v2245_v28 = vadd.f32 %v2244_v30, %v2181_v33  ;;  %v3962_v32 = vpop.f32.mrb[27].mxu0  ;;  %v1735_v1 = vpop.permute.xlu1 %1734 }
 0x1a1   : > { %vm1828_vm3 = vcmp.ne.s32.totalorder %v1735_v1, 0  ;;  %v1936_v0 = vpop.permute.xlu0 %1935 }
 0x1a2   : > { %v1892_v21 = vsel %vm1828_vm3, 1, %v4355_v52  ;;  %vm2118_vm4 = vcmp.eq.s32.totalorder %v1936_v0, 1 }
 0x1a3   : > { %v2182_v37 = vsel %vm2118_vm4, %v1286_v17, 0.0  ;;  %2025 = vperm.xlu1 %2844, %v1892_v21   ;;  %v1068_v17 = vadd.f32 %v3885_v18, %v3924_v25  ;;  %v1071_v18 = vadd.f32 %v3892_v51, %v3924_v25 }
 0x1a4   : > { %v2246_v16 = vadd.f32 %v2245_v28, %v2182_v37  ;;  %v1737_v36 = vpop.permute.xlu1 %1736 }
 0x1a5   : > { %vm1829_vm7 = vcmp.ne.s32.totalorder %v1737_v36, 0  ;;  %v1939_v4 = vpop.permute.xlu0 %1938  ;;  %v3969_v49 = vpop.f32.mrb[28].mxu0 }
 0x1a6   : > { %v1893_v3 = vsel %vm1829_vm7, 1, %v4355_v52  ;;  %vm2119_vm8 = vcmp.eq.s32.totalorder %v1939_v4, 1  ;;  %v3972_v63 = vpop.f32.mrb[29].mxu0 }
 0x1a7   : > { %v2183_v34 = vsel %vm2119_vm8, %v1287_v46, 0.0  ;;  %v3974_v6 = vpop.f32.mrb[30].mxu0  ;;  %2028 = vperm.xlu0 %2843, %v1893_v3   ;;  %v1292_v3 = vmax.f32 %v1068_v17, 0.0 }
 0x1a8   : > { %v2247_v43 = vadd.f32 %v2246_v16, %v2183_v34  ;;  %v3976_v62 = vpop.f32.mrb[31].mxu0  ;;  %v1739_v42 = vpop.permute.xlu1 %1738 }
 0x1a9   : > { %vm1830_vm9 = vcmp.ne.s32.totalorder %v1739_v42, 0  ;;  %v1942_v23 = vpop.permute.xlu0 %1941 }
 0x1aa   : > { %v1894_v8 = vsel %vm1830_vm9, 1, %v4355_v52  ;;  %vm2120_vm10 = vcmp.eq.s32.totalorder %v1942_v23, 1  ;;  %v1293_v23 = vmax.f32 %v1071_v18, 0.0 }
 0x1ab   : > { %v2184_v27 = vsel %vm2120_vm10, %v1288_v7, 0.0  ;;  %2031 = vperm.xlu1 %2844, %v1894_v8   ;;  %v1076_v8 = vadd.f32 %v3924_v25, %v3906_v57  ;;  %v1079_v57 = vadd.f32 %v3924_v25, %v3912_v5 }
 0x1ac   : > { %v2248_v11 = vadd.f32 %v2247_v43, %v2184_v27  ;;  %v1741_v38 = vpop.permute.xlu1 %1740 }
 0x1ad   : > { %vm1831_vm11 = vcmp.ne.s32.totalorder %v1741_v38, 0  ;;  %v1945_v61 = vpop.permute.xlu0 %1944  ;;  %v3983_v53 = vpop.f32.mrb[32].mxu0 }
 0x1ae   : > { %v1895_v14 = vsel %vm1831_vm11, 1, %v4355_v52  ;;  %vm2121_vm12 = vcmp.eq.s32.totalorder %v1945_v61, 1  ;;  %v3986_v40 = vpop.f32.mrb[33].mxu0 }
 0x1af   : > { %v2185_v31 = vsel %vm2121_vm12, %v1289_v13, 0.0  ;;  %v3988_v47 = vpop.f32.mrb[34].mxu0  ;;  %2034 = vperm.xlu0 %2843, %v1895_v14  }
 0x1b0   : > { %v2249_v30 = vadd.f32 %v2248_v11, %v2185_v31  ;;  %v3990_v19 = vpop.f32.mrb[35].mxu0  ;;  %v1743_v10 = vpop.permute.xlu1 %1742 }
 0x1b1   : > { %vm1832_vm13 = vcmp.ne.s32.totalorder %v1743_v10, 0  ;;  %v1948_v15 = vpop.permute.xlu0 %1947 }
 0x1b2   : > { %v1896_v29 = vsel %vm1832_vm13, 1, %v4355_v52  ;;  %vm2122_vm14 = vcmp.eq.s32.totalorder %v1948_v15, 1 }
 0x1b3   : > { %v2186_v33 = vsel %vm2122_vm14, %v1290_v12, 0.0  ;;  %2037 = vperm.xlu1 %2844, %v1896_v29  }
 0x1b4   : > { %v2250_v28 = vadd.f32 %v2249_v30, %v2186_v33  ;;  %v1745_v1 = vpop.permute.xlu1 %1744  ;;  %v1294_v30 = vmax.f32 %v1076_v8, 0.0  ;;  %v1084_v33 = vadd.f32 %v3903_v54, %v3924_v25  ;;  %v1087_v54 = vadd.f32 %v3910_v56, %v3924_v25 }
 0x1b5   : > { %v3997_v0 = vpop.f32.mrb[0].mxu1  ;;  %vm1833_vm15 = vcmp.ne.s32.totalorder %v1745_v1, 0  ;;  %v1951_v21 = vpop.permute.xlu0 %1950 }
 0x1b6   : > { %v1897_v37 = vsel %vm1833_vm15, 1, %v4355_v52  ;;  %vm2123_vm1 = vcmp.eq.s32.totalorder %v1951_v21, 1  ;;  %v4000_v2 = vpop.f32.mrb[1].mxu1 }
 0x1b7   : > { %v2187_v16 = vsel %vm2123_vm1, %v1291_v26, 0.0  ;;  %v4002_v36 = vpop.f32.mrb[2].mxu1  ;;  %2040 = vperm.xlu0 %2843, %v1897_v37  }
 0x1b8   : > { %v2251_v20 = vadd.f32 %v2250_v28, %v2187_v16  ;;  %v4004_v46 = vpop.f32.mrb[3].mxu1  ;;  %v1747_v4 = vpop.permute.xlu1 %1746  ;;  %v1295_v28 = vmax.f32 %v1079_v57, 0.0 }
 0x1b9   : > { %vm1834_vm2 = vcmp.ne.s32.totalorder %v1747_v4, 0  ;;  %v1954_v34 = vpop.permute.xlu0 %1953 }
 0x1ba   : > { %v1898_v43 = vsel %vm1834_vm2, 1, %v4355_v52  ;;  %vm2124_vm5 = vcmp.eq.s32.totalorder %v1954_v34, 1 }
 0x1bb   : > { %v2188_v42 = vsel %vm2124_vm5, %v1292_v3, 0.0  ;;  %2043 = vperm.xlu1 %2844, %v1898_v43   ;;  %v1296_v3 = vmax.f32 %v1084_v33, 0.0 }
 0x1bc   : > { %v2252_v7 = vadd.f32 %v2251_v20, %v2188_v42  ;;  %v1749_v22 = vpop.permute.xlu1 %1748 }
 0x1bd   : > { %v4011_v27 = vpop.f32.mrb[4].mxu1  ;;  %vm1835_vm6 = vcmp.ne.s32.totalorder %v1749_v22, 0  ;;  %v1957_v11 = vpop.permute.xlu0 %1956  ;;  %v1297_v22 = vmax.f32 %v1087_v54, 0.0 }
 0x1be   : > { %v1899_v38 = vsel %vm1835_vm6, 1, %v4355_v52  ;;  %vm2125_vm0 = vcmp.eq.s32.totalorder %v1957_v11, 1  ;;  %v4014_v51 = vpop.f32.mrb[5].mxu1 }
 0x1bf   : > { %v2189_v13 = vsel %vm2125_vm0, %v1293_v23, 0.0  ;;  %v4016_v48 = vpop.f32.mrb[6].mxu1  ;;  %2046 = vperm.xlu0 %2843, %v1899_v38   ;;  %v1092_v23 = vadd.f32 %v3924_v25, %v3926_v39  ;;  %v1095_v39 = vadd.f32 %v3924_v25, %v3933_v59 }
 0x1c0   : > { %v2253_v61 = vadd.f32 %v2252_v7, %v2189_v13  ;;  %v4018_v14 = vpop.f32.mrb[7].mxu1  ;;  %v1751_v31 = vpop.permute.xlu1 %1750 }
 0x1c1   : > { %vm1836_vm3 = vcmp.ne.s32.totalorder %v1751_v31, 0  ;;  %v1960_v10 = vpop.permute.xlu0 %1959 }
 0x1c2   : > { %v1900_v12 = vsel %vm1836_vm3, 1, %v4355_v52  ;;  %vm2126_vm4 = vcmp.eq.s32.totalorder %v1960_v10, 1  ;;  %v1298_v10 = vmax.f32 %v1092_v23, 0.0 }
 0x1c3   : > { %v2190_v60 = vsel %vm2126_vm4, %v1294_v30, 0.0  ;;  %2049 = vperm.xlu1 %2844, %v1900_v12  }
 0x1c4   : > { %v2254_v15 = vadd.f32 %v2253_v61, %v2190_v60  ;;  %v1753_v29 = vpop.permute.xlu1 %1752 }
 0x1c5   : > { %v4025_v1 = vpop.f32.mrb[8].mxu1  ;;  %vm1837_vm7 = vcmp.ne.s32.totalorder %v1753_v29, 0  ;;  %v1963_v17 = vpop.permute.xlu0 %1962 }
 0x1c6   : > { %v1901_v26 = vsel %vm1837_vm7, 1, %v4355_v52  ;;  %vm2127_vm8 = vcmp.eq.s32.totalorder %v1963_v17, 1  ;;  %v4028_v5 = vpop.f32.mrb[9].mxu1  ;;  %v1299_v17 = vmax.f32 %v1095_v39, 0.0 }
 0x1c7   : > { %v2191_v21 = vsel %vm2127_vm8, %v1295_v28, 0.0  ;;  %v4030_v37 = vpop.f32.mrb[10].mxu1  ;;  %2052 = vperm.xlu0 %2843, %v1901_v26   ;;  %v1100_v28 = vadd.f32 %v3918_v35, %v3924_v25  ;;  %v1103_v35 = vadd.f32 %v3929_v24, %v3924_v25 }
 0x1c8   : > { %v2255_v16 = vadd.f32 %v2254_v15, %v2191_v21  ;;  %v4032_v20 = vpop.f32.mrb[11].mxu1  ;;  %v1755_v4 = vpop.permute.xlu1 %1754 }
 0x1c9   : > { %vm1838_vm9 = vcmp.ne.s32.totalorder %v1755_v4, 0  ;;  %v1966_v18 = vpop.permute.xlu0 %1965 }
 0x1ca   : > { %v1902_v34 = vsel %vm1838_vm9, 1, %v4355_v52  ;;  %vm2128_vm10 = vcmp.eq.s32.totalorder %v1966_v18, 1 }
 0x1cb   : > { %v2192_v43 = vsel %vm2128_vm10, %v1296_v3, 0.0  ;;  %2055 = vperm.xlu1 %2844, %v1902_v34  }
 0x1cc   : > { %v2256_v42 = vadd.f32 %v2255_v16, %v2192_v43  ;;  %v1757_v7 = vpop.permute.xlu1 %1756  ;;  %v1300_v43 = vmax.f32 %v1100_v28, 0.0 }
 0x1cd   : > { %v4039_v8 = vpop.f32.mrb[12].mxu1  ;;  %vm1839_vm11 = vcmp.ne.s32.totalorder %v1757_v7, 0  ;;  %v1969_v11 = vpop.permute.xlu0 %1968 }
 0x1ce   : > { %v1903_v38 = vsel %vm1839_vm11, 1, %v4355_v52  ;;  %vm2129_vm12 = vcmp.eq.s32.totalorder %v1969_v11, 1  ;;  %v4042_v56 = vpop.f32.mrb[13].mxu1 }
 0x1cf   : > { %v2193_v13 = vsel %vm2129_vm12, %v1297_v22, 0.0  ;;  %v4044_v61 = vpop.f32.mrb[14].mxu1  ;;  %2058 = vperm.xlu0 %2843, %v1903_v38   ;;  %v1301_v38 = vmax.f32 %v1103_v35, 0.0 }
 0x1d0   : > { %v2257_v31 = vadd.f32 %v2256_v42, %v2193_v13  ;;  %v4046_v30 = vpop.f32.mrb[15].mxu1  ;;  %v1759_v57 = vpop.permute.xlu1 %1758  ;;  %v1108_v13 = vadd.f32 %v3924_v25, %v3944_v41  ;;  %v1111_v41 = vadd.f32 %v3924_v25, %v3948_v44 }
 0x1d1   : > { %vm1840_vm13 = vcmp.ne.s32.totalorder %v1759_v57, 0  ;;  %v1972_v12 = vpop.permute.xlu0 %1971 }
 0x1d2   : > { %v1904_v60 = vsel %vm1840_vm13, 1, %v4355_v52  ;;  %vm2130_vm14 = vcmp.eq.s32.totalorder %v1972_v12, 1 }
 0x1d3   : > { %v2194_v15 = vsel %vm2130_vm14, %v1298_v10, 0.0  ;;  %2061 = vperm.xlu1 %2844, %v1904_v60  }
 0x1d4   : > { %v2258_v29 = vadd.f32 %v2257_v31, %v2194_v15  ;;  %v1761_v33 = vpop.permute.xlu1 %1760 }
 0x1d5   : > { %v4053_v26 = vpop.f32.mrb[16].mxu1  ;;  %vm1841_vm15 = vcmp.ne.s32.totalorder %v1761_v33, 0  ;;  %v1975_v21 = vpop.permute.xlu0 %1974  ;;  %v1302_v33 = vmax.f32 %v1108_v13, 0.0 }
 0x1d6   : > { %v1905_v16 = vsel %vm1841_vm15, 1, %v4355_v52  ;;  %vm2131_vm1 = vcmp.eq.s32.totalorder %v1975_v21, 1  ;;  %v4056_v59 = vpop.f32.mrb[17].mxu1 }
 0x1d7   : > { %v2195_v4 = vsel %vm2131_vm1, %v1299_v17, 0.0  ;;  %v4058_v3 = vpop.f32.mrb[18].mxu1  ;;  %2064 = vperm.xlu0 %2843, %v1905_v16  }
 0x1d8   : > { %v2259_v54 = vadd.f32 %v2258_v29, %v2195_v4  ;;  %v4060_v18 = vpop.f32.mrb[19].mxu1  ;;  %v1763_v34 = vpop.permute.xlu1 %1762 }
 0x1d9   : > { %vm1842_vm2 = vcmp.ne.s32.totalorder %v1763_v34, 0  ;;  %v1978_v42 = vpop.permute.xlu0 %1977  ;;  %v1303_v34 = vmax.f32 %v1111_v41, 0.0  ;;  %v1124_v41 = vadd.f32 %v3924_v25, %v3958_v55 }
 0x1da   : > { %v1906_v7 = vsel %vm1842_vm2, 1, %v4355_v52  ;;  %vm2132_vm5 = vcmp.eq.s32.totalorder %v1978_v42, 1 }
 0x1db   : > { %v2196_v22 = vsel %vm2132_vm5, %v1300_v43, 0.0  ;;  %2067 = vperm.xlu1 %2844, %v1906_v7  }
 0x1dc   : > { %v2260_v23 = vadd.f32 %v2259_v54, %v2196_v22  ;;  %v1765_v11 = vpop.permute.xlu1 %1764  ;;  %v1116_v54 = vadd.f32 %v3941_v9, %v3924_v25  ;;  %v1119_v9 = vadd.f32 %v3946_v45, %v3924_v25 }
 0x1dd   : > { %v4067_v31 = vpop.f32.mrb[20].mxu1  ;;  %vm1843_vm6 = vcmp.ne.s32.totalorder %v1765_v11, 0  ;;  %v1981_v57 = vpop.permute.xlu0 %1980 }
 0x1de   : > { %v1907_v10 = vsel %vm1843_vm6, 1, %v4355_v52  ;;  %vm2133_vm0 = vcmp.eq.s32.totalorder %v1981_v57, 1  ;;  %v4070_v24 = vpop.f32.mrb[21].mxu1  ;;  %v1304_v13 = vmax.f32 %v1116_v54, 0.0  ;;  %v1127_v54 = vadd.f32 %v3924_v25, %v3962_v32 }
 0x1df   : > { %v2197_v39 = vsel %vm2133_vm0, %v1301_v38, 0.0  ;;  %v4072_v12 = vpop.f32.mrb[22].mxu1  ;;  %2070 = vperm.xlu0 %2843, %v1907_v10  }
 0x1e0   : > { %v2261_v60 = vadd.f32 %v2260_v23, %v2197_v39  ;;  %v4074_v15 = vpop.f32.mrb[23].mxu1  ;;  %v1767_v29 = vpop.permute.xlu1 %1766 }
 0x1e1   : > { %vm1844_vm3 = vcmp.ne.s32.totalorder %v1767_v29, 0  ;;  %v1984_v28 = vpop.permute.xlu0 %1983 }
 0x1e2   : > { %v1908_v17 = vsel %vm1844_vm3, 1, %v4355_v52  ;;  %vm2134_vm4 = vcmp.eq.s32.totalorder %v1984_v28, 1 }
 0x1e3   : > { %v2198_v21 = vsel %vm2134_vm4, %v1302_v33, 0.0  ;;  %2073 = vperm.xlu1 %2844, %v1908_v17   ;;  %v1305_v33 = vmax.f32 %v1119_v9, 0.0 }
 0x1e4   : > { %v2262_v16 = vadd.f32 %v2261_v60, %v2198_v21  ;;  %v1769_v4 = vpop.permute.xlu1 %1768 }
 0x1e5   : > { %v4081_v43 = vpop.f32.mrb[24].mxu1  ;;  %vm1845_vm7 = vcmp.ne.s32.totalorder %v1769_v4, 0  ;;  %v1987_v35 = vpop.permute.xlu0 %1986  ;;  %v1306_v4 = vmax.f32 %v1124_v41, 0.0 }
 0x1e6   : > { %v1909_v42 = vsel %vm1845_vm7, 1, %v4355_v52  ;;  %vm2135_vm8 = vcmp.eq.s32.totalorder %v1987_v35, 1  ;;  %v4084_v44 = vpop.f32.mrb[25].mxu1 }
 0x1e7   : > { %v2199_v7 = vsel %vm2135_vm8, %v1303_v34, 0.0  ;;  %v4086_v22 = vpop.f32.mrb[26].mxu1  ;;  %2076 = vperm.xlu0 %2843, %v1909_v42  }
 0x1e8   : > { %v2263_v23 = vadd.f32 %v2262_v16, %v2199_v7  ;;  %v4088_v11 = vpop.f32.mrb[27].mxu1  ;;  %v1771_v38 = vpop.permute.xlu1 %1770 }
 0x1e9   : > { %vm1846_vm9 = vcmp.ne.s32.totalorder %v1771_v38, 0  ;;  %v1990_v57 = vpop.permute.xlu0 %1989  ;;  %v1307_v38 = vmax.f32 %v1127_v54, 0.0 }
 0x1ea   : > { %v1910_v10 = vsel %vm1846_vm9, 1, %v4355_v52  ;;  %vm2136_vm10 = vcmp.eq.s32.totalorder %v1990_v57, 1 }
 0x1eb   : > { %v2200_v39 = vsel %vm2136_vm10, %v1304_v13, 0.0  ;;  %2079 = vperm.xlu1 %2844, %v1910_v10  }
 0x1ec   : > { %v2264_v60 = vadd.f32 %v2263_v23, %v2200_v39  ;;  %v1773_v29 = vpop.permute.xlu1 %1772  ;;  %v1132_v23 = vadd.f32 %v3955_v50, %v3924_v25  ;;  %v2991_v50 = vmov 0.0|0.0  }
 0x1ed   : > { %vm1847_vm11 = vcmp.ne.s32.totalorder %v1773_v29, 0  ;;  %v1993_v28 = vpop.permute.xlu0 %1992  ;;  %2748 = vmatprep.subr.bf16.mxu1 %v2991_v50 }
 0x1ee   : > { %v1911_v17 = vsel %vm1847_vm11, 1, %v4355_v52  ;;  %vm2137_vm12 = vcmp.eq.s32.totalorder %v1993_v28, 1  ;;  %v1308_v39 = vmax.f32 %v1132_v23, 0.0 }
 0x1ef   : > { %v2201_v21 = vsel %vm2137_vm12, %v1305_v33, 0.0  ;;  %2082 = vperm.xlu0 %2843, %v1911_v17  }
 0x1f0   : > { %v2265_v45 = vadd.f32 %v2264_v60, %v2201_v21  ;;  %v1775_v16 = vpop.permute.xlu1 %1774  ;;  %v1135_v60 = vadd.f32 %v3960_v58, %v3924_v25  ;;  %v2319_v58 = vld [vmem:[%s4304_s4] sm:$0xff] }
 0x1f1   : > { %vm1848_vm13 = vcmp.ne.s32.totalorder %v1775_v16, 0  ;;  %v1996_v34 = vpop.permute.xlu0 %1995 }
 0x1f2   : > { %v1912_v35 = vsel %vm1848_vm13, 1, %v4355_v52  ;;  %vm2138_vm14 = vcmp.eq.s32.totalorder %v1996_v34, 1  ;;  %v1309_v21 = vmax.f32 %v1135_v60, 0.0 }
 0x1f3   : > { %v2202_v42 = vsel %vm2138_vm14, %v1306_v4, 0.0  ;;  %2085 = vperm.xlu1 %2844, %v1912_v35   ;;  %v2320_v4 = vld [vmem:[%s4304_s4 + $0x8] sm:$0xff] }
 0x1f4   : > { %v2266_v55 = vadd.f32 %v2265_v45, %v2202_v42  ;;  %v1777_v7 = vpop.permute.xlu1 %1776  ;;  %v1140_v45 = vadd.f32 %v3924_v25, %v3972_v63  ;;  %v2749_v34 = vpack.c.bf16 %v2320_v4, %v2319_v58  ;;  %v2324_v58 = vld [vmem:[%s4304_s4 + $0x28] sm:$0xff] }
 0x1f5   : > { %vm1849_vm15 = vcmp.ne.s32.totalorder %v1777_v7, 0  ;;  %v1999_v13 = vpop.permute.xlu0 %1998  ;;  %v1143_v7 = vadd.f32 %v3924_v25, %v3976_v62 }
 0x1f6   : > { %v1913_v9 = vsel %vm1849_vm15, 1, %v4355_v52  ;;  %vm2139_vm1 = vcmp.eq.s32.totalorder %v1999_v13, 1  ;;  %2750 = vmatpush3.bf16.msra.mxu1 %v2749_v34  ;;  %v1310_v63 = vmax.f32 %v1140_v45, 0.0  ;;  %v2322_v13 = vld [vmem:[%s4304_s4 + $0x18] sm:$0xff]  ;;  %v1151_v45 = vadd.f32 %v3974_v6, %v3924_v25 }
 0x1f7   : > { %v2203_v57 = vsel %vm2139_vm1, %v1307_v38, 0.0  ;;  %2088 = vperm.xlu0 %2843, %v1913_v9   ;;  %2751 = vmatprep.subr.bf16.mxu1 %v2991_v50  ;;  %v2321_v38 = vld [vmem:[%s4304_s4 + $0x10] sm:$0xff]  ;;  %v1311_v60 = vmax.f32 %v1143_v7, 0.0 }
 0x1f8   : > { %v2267_v32 = vadd.f32 %v2266_v55, %v2203_v57  ;;  %v1779_v10 = vpop.permute.xlu1 %1778  ;;  %v2752_v57 = vpack.c.bf16 %v2322_v13, %v2321_v38  ;;  %v1313_v6 = vmax.f32 %v1151_v45, 0.0  ;;  %v2325_v13 = vld [vmem:[%s4304_s4 + $0x30] sm:$0xff] }
 0x1f9   : > { %vm1850_vm2 = vcmp.ne.s32.totalorder %v1779_v10, 0  ;;  %v2002_v29 = vpop.permute.xlu0 %2001 }
 0x1fa   : > { %v1914_v33 = vsel %vm1850_vm2, 1, %v4355_v52  ;;  %vm2140_vm5 = vcmp.eq.s32.totalorder %v2002_v29, 1  ;;  %2753 = vmatpush3.bf16.msra.mxu1 %v2752_v57 }
 0x1fb   : > { %v2204_v41 = vsel %vm2140_vm5, %v1308_v39, 0.0  ;;  %2091 = vperm.xlu1 %2844, %v1914_v33   ;;  %v1148_v39 = vadd.f32 %v3969_v49, %v3924_v25  ;;  %2754 = vmatprep.subr.bf16.mxu1 %v2991_v50  ;;  %v2323_v49 = vld [vmem:[%s4304_s4 + $0x20] sm:$0xff] }
 0x1fc   : > { %v2268_v28 = vadd.f32 %v2267_v32, %v2204_v41  ;;  %v1781_v17 = vpop.permute.xlu1 %1780 }
 0x1fd   : > { %vm1851_vm6 = vcmp.ne.s32.totalorder %v1781_v17, 0  ;;  %v2005_v16 = vpop.permute.xlu0 %2004 }
 0x1fe   : > { %v1915_v54 = vsel %vm1851_vm6, 1, %v4355_v52  ;;  %vm2141_vm0 = vcmp.eq.s32.totalorder %v2005_v16, 1  ;;  %vm2993_vm6 = vmmov 0  }
 0x1ff   : > { %v2205_v35 = vsel %vm2141_vm0, %v1309_v21, 0.0  ;;  %2094 = vperm.xlu0 %2843, %v1915_v54   ;;  %v1312_v21 = vmax.f32 %v1148_v39, 0.0  ;;  %v2755_v54 = vpack.c.bf16 %v2324_v58, %v2323_v49  ;;  %v2992_v49 = vmov 0.0  }
 0x200   : > { %v2269_v42 = vadd.f32 %v2268_v28, %v2205_v35  ;;  %v1783_v55 = vpop.permute.xlu1 %1782  ;;  %354 = vst [vmem:[#allocation2] sm:$0x1] %v2992_v49  ;;  %v1167_v58 = vadd.f32 %v3988_v47, %v3924_v25  ;;  %v2330_v47 = vld [vmem:[%s4304_s4 + $0x58] sm:$0xff]  ;;  %2745 = vmatprep.mubr.msk.f32.mxu1 %vm2993_vm6, %v2992_v49 }
 0x201   : > { %vm1852_vm3 = vcmp.ne.s32.totalorder %v1783_v55, 0  ;;  %v2008_v23 = vpop.permute.xlu0 %2007  ;;  %2756 = vmatpush3.bf16.msra.mxu1 %v2755_v54 }
 0x202   : > { %v1916_v9 = vsel %vm1852_vm3, 1, %v4355_v52  ;;  %vm2142_vm4 = vcmp.eq.s32.totalorder %v2008_v23, 1  ;;  %2757 = vmatprep.subr.bf16.mxu1 %v2991_v50 }
 0x203   : > { %v2206_v32 = vsel %vm2142_vm4, %v1310_v63, 0.0  ;;  %2097 = vperm.xlu1 %2844, %v1916_v9   ;;  %v2326_v9 = vld [vmem:[%s4304_s4 + $0x38] sm:$0xff] }
 0x204   : > { %v2270_v10 = vadd.f32 %v2269_v42, %v2206_v32  ;;  %v1785_v62 = vpop.permute.xlu1 %1784  ;;  %v2758_v32 = vpack.c.bf16 %v2326_v9, %v2325_v13 }
 0x205   : > { %vm1853_vm7 = vcmp.ne.s32.totalorder %v1785_v62, 0  ;;  %v2011_v29 = vpop.permute.xlu0 %2010  ;;  %v1156_v62 = vadd.f32 %v3924_v25, %v3986_v40 }
 0x206   : > { %v1917_v33 = vsel %vm1853_vm7, 1, %v4355_v52  ;;  %vm2143_vm8 = vcmp.eq.s32.totalorder %v2011_v29, 1  ;;  %2759 = vmatpush3.bf16.msra.mxu1 %v2758_v32  ;;  %v1159_v29 = vadd.f32 %v3924_v25, %v3990_v19  ;;  %v2327_v19 = vld [vmem:[%s4304_s4 + $0x40] sm:$0xff] }
 0x207   : > { %v2207_v41 = vsel %vm2143_vm8, %v1311_v60, 0.0  ;;  %2100 = vperm.xlu0 %2843, %v1917_v33   ;;  %2760 = vmatprep.subr.bf16.mxu1 %v2991_v50  ;;  %v1314_v60 = vmax.f32 %v1156_v62, 0.0  ;;  %v2333_v62 = vld [vmem:[%s4304_s4 + $0x70] sm:$0xff] }
 0x208   : > { %v2271_v28 = vadd.f32 %v2270_v10, %v2207_v41  ;;  %v1787_v17 = vpop.permute.xlu1 %1786 }
 0x209   : > { %vm1854_vm9 = vcmp.ne.s32.totalorder %v1787_v17, 0  ;;  %v2014_v16 = vpop.permute.xlu0 %2013  ;;  %v1164_v17 = vadd.f32 %v3983_v53, %v3924_v25  ;;  %v2328_v53 = vld [vmem:[%s4304_s4 + $0x48] sm:$0xff] }
 0x20a   : > { %v1918_v4 = vsel %vm1854_vm9, 1, %v4355_v52  ;;  %vm2144_vm10 = vcmp.eq.s32.totalorder %v2014_v16, 1  ;;  %v2761_v54 = vpack.c.bf16 %v2328_v53, %v2327_v19 }
 0x20b   : > { %v2208_v34 = vsel %vm2144_vm10, %v1312_v21, 0.0  ;;  %2103 = vperm.xlu1 %2844, %v1918_v4   ;;  %v1315_v21 = vmax.f32 %v1159_v29, 0.0 }
 0x20c   : > { %v2272_v35 = vadd.f32 %v2271_v28, %v2208_v34  ;;  %v1789_v42 = vpop.permute.xlu1 %1788  ;;  %2762 = vmatpush3.bf16.msra.mxu1 %v2761_v54  ;;  %v1191_v54 = vadd.f32 %v3924_v25, %v4018_v14 }
 0x20d   : > { %vm1855_vm11 = vcmp.ne.s32.totalorder %v1789_v42, 0  ;;  %v2017_v55 = vpop.permute.xlu0 %2016  ;;  %v2329_v42 = vld [vmem:[%s4304_s4 + $0x50] sm:$0xff]  ;;  %2763 = vmatprep.subr.bf16.mxu1 %v2991_v50 }
 0x20e   : > { %v1919_v63 = vsel %vm1855_vm11, 1, %v4355_v52  ;;  %vm2145_vm12 = vcmp.eq.s32.totalorder %v2017_v55, 1  ;;  %v1172_v55 = vadd.f32 %v3924_v25, %v4000_v2  ;;  %v1175_v2 = vadd.f32 %v3924_v25, %v4004_v46 }
 0x20f   : > { %v2209_v7 = vsel %vm2145_vm12, %v1313_v6, 0.0  ;;  %2106 = vperm.xlu0 %2843, %v1919_v63   ;;  %v1317_v6 = vmax.f32 %v1167_v58, 0.0  ;;  %v1180_v46 = vadd.f32 %v3997_v0, %v3924_v25  ;;  %v1188_v0 = vadd.f32 %v3924_v25, %v4014_v51 }
 0x210   : > { %v2273_v23 = vadd.f32 %v2272_v35, %v2209_v7  ;;  %v1791_v38 = vpop.permute.xlu1 %1790  ;;  %v2764_v7 = vpack.c.bf16 %v2330_v47, %v2329_v42  ;;  %v1318_v32 = vmax.f32 %v1172_v55, 0.0  ;;  %v1196_v42 = vadd.f32 %v4011_v27, %v3924_v25 }
 0x211   : > { %vm1856_vm13 = vcmp.ne.s32.totalorder %v1791_v38, 0  ;;  %v2332_v38 = vld [vmem:[%s4304_s4 + $0x68] sm:$0xff]  ;;  %v1322_v53 = vmax.f32 %v1188_v0, 0.0  ;;  %v1323_v47 = vmax.f32 %v1191_v54, 0.0 }
 0x212   : > { %v1920_v57 = vsel %vm1856_vm13, 1, %v4355_v52  ;;  %2765 = vmatpush3.bf16.msra.mxu1 %v2764_v7  ;;  %v1199_v7 = vadd.f32 %v4016_v48, %v3924_v25 }
 0x213   : > { %2109 = vperm.xlu1 %2844, %v1920_v57   ;;  %2766 = vmatprep.subr.bf16.mxu1 %v2991_v50 }
 0x214   : > { %v1793_v10 = vpop.permute.xlu1 %1792 }
 0x215   : > { %vm1857_vm14 = vcmp.ne.s32.totalorder %v1793_v10, 0 }
 0x216   : > { %v1921_v39 = vsel %vm1857_vm14, 1, %v4355_v52  ;;  %v1316_v52 = vmax.f32 %v1164_v17, 0.0 }
 0x217   : > { %2112 = vperm.xlu0 %2843, %v1921_v39   ;;  %v2334_v39 = vld [vmem:[%s4304_s4 + $0x78] sm:$0xff] }
 0x21a   : > { %v2020_v33 = vpop.permute.xlu0 %2019 }
 0x21b   : > { %vm2146_vm15 = vcmp.eq.s32.totalorder %v2020_v33, 1  ;;  %v2770_v33 = vpack.c.bf16 %v2334_v39, %v2333_v62 }
 0x21c   : > { %v2210_v41 = vsel %vm2146_vm15, %v1314_v60, 0.0 }
 0x21d   : > { %v2274_v28 = vadd.f32 %v2273_v23, %v2210_v41  ;;  %v2331_v23 = vld [vmem:[%s4304_s4 + $0x60] sm:$0xff]  ;;  %v1319_v41 = vmax.f32 %v1175_v2, 0.0 }
 0x21e   : > { %v2023_v45 = vpop.permute.xlu0 %2022  ;;  %v2767_v57 = vpack.c.bf16 %v2332_v38, %v2331_v23 }
 0x21f   : > { %vm2147_vm1 = vcmp.eq.s32.totalorder %v2023_v45, 1  ;;  %v1320_v45 = vmax.f32 %v1180_v46, 0.0 }
 0x220   : > { %v2211_v16 = vsel %vm2147_vm1, %v1315_v21, 0.0  ;;  %2768 = vmatpush3.bf16.msra.mxu1 %v2767_v57 }
 0x221   : > { %v2275_v40 = vadd.f32 %v2274_v28, %v2211_v16  ;;  %2769 = vmatprep.subr.bf16.mxu1 %v2991_v50  ;;  %v1183_v16 = vadd.f32 %v4002_v36, %v3924_v25 }
 0x222   : > { %v2026_v4 = vpop.permute.xlu1 %2025 }
 0x223   : > { %vm2148_vm2 = vcmp.eq.s32.totalorder %v2026_v4, 1  ;;  %v1321_v58 = vmax.f32 %v1183_v16, 0.0  ;;  %v1220_v16 = vadd.f32 %v3924_v25, %v4042_v56 }
 0x224   : > { %v2212_v34 = vsel %vm2148_vm2, %v1316_v52, 0.0  ;;  %2771 = vmatpush3.bf16.msra.mxu1 %v2770_v33 }
 0x225   : > { %v2276_v35 = vadd.f32 %v2275_v40, %v2212_v34 }
 0x226   : > { %v2029_v63 = vpop.permute.xlu0 %2028 }
 0x227   : > { %vm2149_vm5 = vcmp.eq.s32.totalorder %v2029_v63, 1  ;;  %v1324_v63 = vmax.f32 %v1196_v42, 0.0 }
 0x228   : > { %v2213_v13 = vsel %vm2149_vm5, %v1317_v6, 0.0 }
 0x229   : > { %v2277_v9 = vadd.f32 %v2276_v35, %v2213_v13  ;;  %v1325_v13 = vmax.f32 %v1199_v7, 0.0 }
 0x22a   : > { %v2032_v10 = vpop.permute.xlu1 %2031 }
 0x22b   : > { %vm2150_vm0 = vcmp.eq.s32.totalorder %v2032_v10, 1  ;;  %v1207_v10 = vadd.f32 %v3924_v25, %v4032_v20 }
 0x22c   : > { %v2214_v60 = vsel %vm2150_vm0, %v1318_v32, 0.0 }
 0x22d   : > { %v2278_v29 = vadd.f32 %v2277_v9, %v2214_v60  ;;  %v1204_v9 = vadd.f32 %v3924_v25, %v4028_v5  ;;  %v1212_v60 = vadd.f32 %v4025_v1, %v3924_v25 }
 0x22e   : > { %v2035_v28 = vpop.permute.xlu0 %2034 }
 0x22f   : > { %vm2151_vm3 = vcmp.eq.s32.totalorder %v2035_v28, 1  ;;  %v1326_v2 = vmax.f32 %v1204_v9, 0.0  ;;  %v1215_v28 = vadd.f32 %v4030_v37, %v3924_v25 }
 0x230   : > { %v2215_v17 = vsel %vm2151_vm3, %v1319_v41, 0.0  ;;  %v1328_v41 = vmax.f32 %v1212_v60, 0.0 }
 0x231   : > { %v2279_v21 = vadd.f32 %v2278_v29, %v2215_v17  ;;  %v1327_v29 = vmax.f32 %v1207_v10, 0.0 }
 0x232   : > { %v2038_v49 = vpop.permute.xlu1 %2037 }
 0x233   : > { %vm2152_vm4 = vcmp.eq.s32.totalorder %v2038_v49, 1 }
 0x234   : > { %v2216_v40 = vsel %vm2152_vm4, %v1320_v45, 0.0  ;;  %v1329_v45 = vmax.f32 %v1215_v28, 0.0 }
 0x235   : > { %v2280_v52 = vadd.f32 %v2279_v21, %v2216_v40 }
 0x236   : > { %v2041_v4 = vpop.permute.xlu0 %2040 }
 0x237   : > { %vm2153_vm7 = vcmp.eq.s32.totalorder %v2041_v4, 1 }
 0x238   : > { %v2217_v19 = vsel %vm2153_vm7, %v1321_v58, 0.0  ;;  %v4213_v58 = vld [vmem:[%s4303_s3] ss:$0 sm:$0xff] }
 0x239   : > { %v2281_v50 = vadd.f32 %v2280_v52, %v2217_v19  ;;  %v1330_v52 = vmax.f32 %v1220_v16, 0.0  ;;  %v1223_v37 = vadd.f32 %v4213_v58, %v4046_v30  ;;  %v1228_v25 = vadd.f32 %v4213_v58, %v4039_v8 }
 0x23a   : > { %v2044_v34 = vpop.permute.xlu1 %2043  ;;  %v1239_v7 = vadd.f32 %v4213_v58, %v4060_v18 }
 0x23b   : > { %vm2154_vm8 = vcmp.eq.s32.totalorder %v2044_v34, 1  ;;  %v1331_v56 = vmax.f32 %v1223_v37, 0.0  ;;  %v1332_v34 = vmax.f32 %v1228_v25, 0.0 }
 0x23c   : > { %v2218_v35 = vsel %vm2154_vm8, %v1322_v53, 0.0 }
 0x23d   : > { %v2282_v36 = vadd.f32 %v2281_v50, %v2218_v35  ;;  %v1231_v35 = vadd.f32 %v4213_v58, %v4044_v61 }
 0x23e   : > { %v2047_v6 = vpop.permute.xlu0 %2046 }
 0x23f   : > { %vm2155_vm9 = vcmp.eq.s32.totalorder %v2047_v6, 1  ;;  %v1236_v6 = vadd.f32 %v4213_v58, %v4056_v59 }
 0x240   : > { %v2219_v55 = vsel %vm2155_vm9, %v1323_v47, 0.0  ;;  %v1333_v47 = vmax.f32 %v1231_v35, 0.0  ;;  %v1279_v35 = vadd.f32 %v4213_v58, %v4086_v22 }
 0x241   : > { %v2283_v51 = vadd.f32 %v2282_v36, %v2219_v55 }
 0x242   : > { %v2050_v23 = vpop.permute.xlu1 %2049 }
 0x243   : > { %vm2156_vm10 = vcmp.eq.s32.totalorder %v2050_v23, 1 }
 0x244   : > { %v2220_v38 = vsel %vm2156_vm10, %v1324_v63, 0.0  ;;  %v1334_v63 = vmax.f32 %v1236_v6, 0.0 }
 0x245   : > { %v2284_v14 = vadd.f32 %v2283_v51, %v2220_v38 }
 0x246   : > { %v2053_v57 = vpop.permute.xlu0 %2052 }
 0x247   : > { %vm2157_vm11 = vcmp.eq.s32.totalorder %v2053_v57, 1 }
 0x248   : > { %v2221_v27 = vsel %vm2157_vm11, %v1325_v13, 0.0  ;;  %v1335_v13 = vmax.f32 %v1239_v7, 0.0 }
 0x249   : > { %v2285_v32 = vadd.f32 %v2284_v14, %v2221_v27  ;;  %v1244_v14 = vadd.f32 %v4213_v58, %v4053_v26 }
 0x24a   : > { %v2056_v62 = vpop.permute.xlu1 %2055 }
 0x24b   : > { %vm2158_vm12 = vcmp.eq.s32.totalorder %v2056_v62, 1  ;;  %v1336_v27 = vmax.f32 %v1244_v14, 0.0  ;;  %v2335_v14 = vld [vmem:[%s4305_s5] sm:$0x1] }
 0x24c   : > { %v2222_v39 = vsel %vm2158_vm12, %v1326_v2, 0.0 }
 0x24d   : > { %v2286_v48 = vadd.f32 %v2285_v32, %v2222_v39  ;;  %v1247_v32 = vadd.f32 %v4213_v58, %v4058_v3  ;;  %v1252_v39 = vadd.f32 %v4213_v58, %v4070_v24 }
 0x24e   : > { %v2059_v33 = vpop.permute.xlu0 %2058 }
 0x24f   : > { %vm2159_vm13 = vcmp.eq.s32.totalorder %v2059_v33, 1  ;;  %v1337_v62 = vmax.f32 %v1247_v32, 0.0  ;;  %v1255_v33 = vadd.f32 %v4213_v58, %v4074_v15 }
 0x250   : > { %v2223_v46 = vsel %vm2159_vm13, %v1327_v29, 0.0  ;;  %v1338_v29 = vmax.f32 %v1252_v39, 0.0 }
 0x251   : > { %v2287_v5 = vadd.f32 %v2286_v48, %v2223_v46  ;;  %v1339_v28 = vmax.f32 %v1255_v33, 0.0 }
 0x252   : > { %v2062_v17 = vpop.permute.xlu1 %2061 }
 0x253   : > { %vm2160_vm14 = vcmp.eq.s32.totalorder %v2062_v17, 1 }
 0x254   : > { %v2224_v21 = vsel %vm2160_vm14, %v1328_v41, 0.0  ;;  %v1260_v41 = vadd.f32 %v4213_v58, %v4067_v31 }
 0x255   : > { %v2288_v20 = vadd.f32 %v2287_v5, %v2224_v21 }
 0x256   : > { %v2065_v49 = vpop.permute.xlu0 %2064 }
 0x257   : > { %vm2161_vm15 = vcmp.eq.s32.totalorder %v2065_v49, 1 }
 0x258   : > { %v2225_v1 = vsel %vm2161_vm15, %v1329_v45, 0.0  ;;  %v1263_v45 = vadd.f32 %v4213_v58, %v4072_v12 }
 0x259   : > { %v2289_v40 = vadd.f32 %v2288_v20, %v2225_v1  ;;  %v1340_v20 = vmax.f32 %v1260_v41, 0.0 }
 0x25a   : > { %v2068_v0 = vpop.permute.xlu1 %2067  ;;  %v1341_v1 = vmax.f32 %v1263_v45, 0.0 }
 0x25b   : > { %vm2162_vm1 = vcmp.eq.s32.totalorder %v2068_v0, 1 }
 0x25c   : > { %v2226_v4 = vsel %vm2162_vm1, %v1330_v52, 0.0 }
 0x25d   : > { %v2290_v19 = vadd.f32 %v2289_v40, %v2226_v4  ;;  %v1268_v40 = vadd.f32 %v4213_v58, %v4084_v44  ;;  %v1271_v4 = vadd.f32 %v4213_v58, %v4088_v11 }
 0x25e   : > { %v2071_v50 = vpop.permute.xlu0 %2070 }
 0x25f   : > { %vm2163_vm2 = vcmp.eq.s32.totalorder %v2071_v50, 1  ;;  %v1342_v0 = vmax.f32 %v1268_v40, 0.0  ;;  %v1343_v50 = vmax.f32 %v1271_v4, 0.0 }
 0x260   : > { %v2227_v53 = vsel %vm2163_vm2, %v1331_v56, 0.0  ;;  %v1276_v56 = vadd.f32 %v4213_v58, %v4081_v43 }
 0x261   : > { %v2291_v54 = vadd.f32 %v2290_v19, %v2227_v53 }
 0x262   : > { %v2074_v36 = vpop.permute.xlu1 %2073 }
 0x263   : > { %vm2164_vm5 = vcmp.eq.s32.totalorder %v2074_v36, 1 }
 0x264   : > { %v2228_v42 = vsel %vm2164_vm5, %v1332_v34, 0.0  ;;  %v1344_v34 = vmax.f32 %v1276_v56, 0.0 }
 0x265   : > { %v2292_v30 = vadd.f32 %v2291_v54, %v2228_v42 }
 0x266   : > { %v2077_v55 = vpop.permute.xlu0 %2076 }
 0x267   : > { %vm2165_vm6 = vcmp.eq.s32.totalorder %v2077_v55, 1 }
 0x268   : > { %v2229_v8 = vsel %vm2165_vm6, %v1333_v47, 0.0 }
 0x269   : > { %v2293_v51 = vadd.f32 %v2292_v30, %v2229_v8  ;;  %v1345_v30 = vmax.f32 %v1279_v35, 0.0 }
 0x26a   : > { %v2080_v23 = vpop.permute.xlu1 %2079 }
 0x26b   : > { %vm2166_vm0 = vcmp.eq.s32.totalorder %v2080_v23, 1  ;;  %v2242_v23 = vld [vmem:[#allocation2] sm:$0x1] }
 0x26c   : > { %v2230_v38 = vsel %vm2166_vm0, %v1334_v63, 0.0 }
 0x26d   : > { %v2294_v61 = vadd.f32 %v2293_v51, %v2230_v38 }
 0x26e   : > { %v2083_v9 = vpop.permute.xlu0 %2082 }
 0x26f   : > { %vm2167_vm3 = vcmp.eq.s32.totalorder %v2083_v9, 1 }
 0x270   : > { %v2231_v57 = vsel %vm2167_vm3, %v1335_v13, 0.0 }
 0x271   : > { %v2295_v59 = vadd.f32 %v2294_v61, %v2231_v57 }
 0x272   : > { %v2086_v2 = vpop.permute.xlu1 %2085 }
 0x273   : > { %vm2168_vm4 = vcmp.eq.s32.totalorder %v2086_v2, 1 }
 0x274   : > { %v2232_v10 = vsel %vm2168_vm4, %v1336_v27, 0.0 }
 0x275   : > { %v2296_v18 = vadd.f32 %v2295_v59, %v2232_v10 }
 0x276   : > { %v2089_v48 = vpop.permute.xlu0 %2088 }
 0x277   : > { %vm2169_vm7 = vcmp.eq.s32.totalorder %v2089_v48, 1 }
 0x278   : > { %v2233_v26 = vsel %vm2169_vm7, %v1337_v62, 0.0 }
 0x279   : > { %v2297_v60 = vadd.f32 %v2296_v18, %v2233_v26 }
 0x27a   : > { %v2092_v46 = vpop.permute.xlu1 %2091 }
 0x27b   : > { %vm2170_vm8 = vcmp.eq.s32.totalorder %v2092_v46, 1 }
 0x27c   : > { %v2234_v5 = vsel %vm2170_vm8, %v1338_v29, 0.0 }
 0x27d   : > { %v2298_v3 = vadd.f32 %v2297_v60, %v2234_v5 }
 0x27e   : > { %v2095_v17 = vpop.permute.xlu0 %2094 }
 0x27f   : > { %vm2171_vm9 = vcmp.eq.s32.totalorder %v2095_v17, 1 }
 0x280   : > { %v2235_v21 = vsel %vm2171_vm9, %v1339_v28, 0.0 }
 0x281   : > { %v2299_v24 = vadd.f32 %v2298_v3, %v2235_v21 }
 0x282   : > { %v2098_v16 = vpop.permute.xlu1 %2097 }
 0x283   : > { %vm2172_vm10 = vcmp.eq.s32.totalorder %v2098_v16, 1 }
 0x284   : > { %v2236_v49 = vsel %vm2172_vm10, %v1340_v20, 0.0 }
 0x285   : > { %v2300_v15 = vadd.f32 %v2299_v24, %v2236_v49 }
 0x286   : > { %v2101_v52 = vpop.permute.xlu0 %2100 }
 0x287   : > { %vm2173_vm11 = vcmp.eq.s32.totalorder %v2101_v52, 1 }
 0x288   : > { %v2237_v31 = vsel %vm2173_vm11, %v1341_v1, 0.0 }
 0x289   : > { %v2301_v37 = vadd.f32 %v2300_v15, %v2237_v31 }
 0x28a   : > { %v2104_v19 = vpop.permute.xlu1 %2103 }
 0x28b   : > { %vm2174_vm12 = vcmp.eq.s32.totalorder %v2104_v19, 1 }
 0x28c   : > { %v2238_v25 = vsel %vm2174_vm12, %v1342_v0, 0.0 }
 0x28d   : > { %v2302_v12 = vadd.f32 %v2301_v37, %v2238_v25 }
 0x28e   : > { %v2107_v53 = vpop.permute.xlu0 %2106 }
 0x28f   : > { %vm2175_vm13 = vcmp.eq.s32.totalorder %v2107_v53, 1 }
 0x290   : > { %v2239_v54 = vsel %vm2175_vm13, %v1343_v50, 0.0 }
 0x291   : > { %v2303_v44 = vadd.f32 %v2302_v12, %v2239_v54 }
 0x292   : > { %v2110_v36 = vpop.permute.xlu1 %2109 }
 0x293   : > { %vm2176_vm14 = vcmp.eq.s32.totalorder %v2110_v36, 1 }
 0x294   : > { %v2240_v42 = vsel %vm2176_vm14, %v1344_v34, 0.0 }
 0x295   : > { %v2304_v11 = vadd.f32 %v2303_v44, %v2240_v42 }
 0x296   : > { %v2113_v47 = vpop.permute.xlu0 %2112 }
 0x297   : > { %vm2177_vm15 = vcmp.eq.s32.totalorder %v2113_v47, 1 }
 0x298   : > { %v2241_v6 = vsel %vm2177_vm15, %v1345_v30, 0.0 }
 0x299   : > { %v2305_v43 = vadd.f32 %v2304_v11, %v2241_v6 }
 0x29b   : > { %v2306_v55 = vrot.slane %v2305_v43, 4 }
 0x29d   : > { %v2307_v8 = vadd.f32 %v2306_v55, %v2305_v43 }
 0x29f   : > { %v2308_v51 = vrot.slane %v2307_v8, 2 }
 0x2a1   : > { %v2309_v63 = vadd.f32 %v2308_v51, %v2307_v8 }
 0x2a3   : > { %v2310_v7 = vrot.slane %v2309_v63, 1 }
 0x2a5   : > { %v2311_v38 = vadd.f32 %v2310_v7, %v2309_v63 }
 0x2a7   : > { %v2312_v61 = vadd.f32 %v2311_v38, %v2242_v23 }
 0x2a9   : > { %2313 = vst [vmem:[#allocation2] sm:$0x1] %v2312_v61 }
 0x2b0   : > { %v2317_v22 = vld [vmem:[#allocation2] sm:$0x1] }
 0x2b1   : > { %v2318_v58 = vmul.f32 0.00390625, %v2317_v22 }
 0x2b3   : > { %2746 = vmatmul.mubr.f32.vlgmr.msra.gmra.mrb[28].mxu1 %v2318_v58 }
 0x386   : > { %v2402_v13 = vpop.f32.mrb[28].mxu1 }
 0x387   : > { %v2403_v9 = vadd.f32 %v2402_v13, %v2335_v14  ;;  %v2747_v57 = vpop.f32.mrb[29].mxu1 }
 0x389   : > { %2406 = vst [vmem:[%s314_s14] sm:$0x1] %v2403_v9 }
 0x38a   : > { %2920 = shalt.err (!%p2917_p5)
}
 0x38b   : > { %s2921_s28 = scalar_lea.hbm %s4253_s17, 16  ;;  %s2925_s11 = scalar_lea.hbm %s4306_s6, 32 }
 0x38c   : > { %p2922_p6 = scmp.ne.s32.totalorder %s4253_s17, %s2921_s28  ;;  %p2926_p10 = scmp.lt.u32.totalorder %s4253_s17, %s4306_s6 }
 0x38d   : > { %p2927_p11 = scmp.lt.u32.totalorder %s2925_s11, %s2921_s28  ;;  %p2929_p13 = scmp.lt.u32.totalorder %s2921_s28, %s4253_s17 }
 0x38e   : > { %p2923_p7 = pnand %p2922_p6, %p3070_p4 }
 0x38f   : > { %p2928_p12 = por %p2927_p11, %p2926_p10 }
 0x390   : > { %p2924_p9 = pneg %p2923_p7 }
 0x391   : > { %p2930_p0 = por %p2929_p13, %p2928_p12 }
 0x393   : > { %p2931_p1 = pnand %p2930_p0, %p2924_p9 }
 0x395   : > { %2934 = shalt.err (!%p2931_p1)
}
 0x396   : > { %2780 = dma.vmem_to_hbm [thread:$0]  (%p3070_p4), %s4255_s13, 16, %s4253_s17, %s2408_s18  }
 0x397 PF: > { %p2787_p2 = scmp.ge.s32.totalorder %s2985_s26, 2  ;;  %s2432_s15 = sand.u32 1, %s2965_s21  }
 0x398   : > { %s2433_s16 = scalar_lea.sflag [#allocation4], %s2432_s15 }
 0x399   : > { %p2783_p3 = pnand %p2787_p2, %p3077_p8 }
 0x39b   : > { %2960 = dma.done.wait (!%p2783_p3), %s2433_s16, 16  }
 0x39c   : > { %2962 = vsyncadd (!%p2783_p3), %s2433_s16, 4294967280  ;;  %s19_s26 = sadd.s32 1, %s2985_s26   ;;  %s4378_s21 = smov %s2969_s22 }
 0x39d   : > { %p16_p5 = scmp.ge.s32.totalorder %s19_s26, 4   ;;  %s4379_s22 = smov %s2973_s23 }
 0x39e   : > { %s4380_s23 = smov %s3083_s10  ;;  %s4381_s24 = smov %s2981_s25 }
 0x39f   : > { %s4382_s25 = smov %s4384_s29  ;;  %18 = sbr.rel (!%p16_p5) target bundleno = 4 (0x4), region = 90 }
 0x3a6   :  { %2437 = vsyncpa [#allocation4], 1 }
 0x3a7   :  { %2439 = vsyncpa [#allocation4 + $0x1], 1 }

</bundles_post_ra>
